<compile_context>
chip_gen: v5e
topology: v5e:2x2
jax: 0.10.0
libtpu: 0.0.40
codegen_flags: <defaults>
</compile_context>

<pallas_src>
import functools

import jax
import jax.numpy as jnp
from jax.experimental import pallas as pl
from jax.experimental.pallas import tpu as pltpu


def make_attention_kernel(head_dim: int):
    scale = 1.0 / (head_dim ** 0.5)

    def kernel(q_ref, kt_ref, vt_ref,
               wq_ref, bq_ref, wk_ref, bk_ref, wv_ref, bv_ref,
               wo_ref, bo_ref, hmask_ref, bias_ref, o_ref):
        nb, T, D = q_ref.shape
        HS = kt_ref.shape[1]          # num_heads * src_len
        bf16 = jnp.bfloat16

        # ---- Q/K/V projections: row-batched bf16 MXU matmuls, f32 accumulate.
        q = jnp.dot(q_ref[...].reshape(nb * T, D).astype(bf16), wq_ref[...],
                    preferred_element_type=jnp.float32) + bq_ref[...]
        k = jnp.dot(kt_ref[...].reshape(nb * HS, D).astype(bf16), wk_ref[...],
                    preferred_element_type=jnp.float32) + bk_ref[...]
        v = jnp.dot(vt_ref[...].reshape(nb * HS, D).astype(bf16), wv_ref[...],
                    preferred_element_type=jnp.float32) + bv_ref[...]

        # Fold 1/sqrt(head_dim) into Q once (one VPU multiply, in-kernel).
        q = q * scale

        # Block-diagonal head mask (HS, D): row-block h keeps only head h's
        # columns, so the single batched matmuls below never mix heads.
        hmask = hmask_ref[...]
        k3 = (k.reshape(nb, HS, D) * hmask).astype(bf16)
        v3 = (v.reshape(nb, HS, D) * hmask).astype(bf16)
        q3 = q.reshape(nb, T, D).astype(bf16)

        # All-head scores in one batched matmul: (nb, T, HS); head h lives in
        # columns [h*S, (h+1)*S).
        s = jax.lax.dot_general(q3, k3, (((2,), (2,)), ((0,), (0,))),
                                preferred_element_type=jnp.float32)
        s = s + bias_ref[...]                       # causal bias (0 / -1e30)

        # Per-head softmax: subtracting the full-row max is valid per block.
        s = s - jnp.max(s, axis=-1, keepdims=True)
        e = jnp.exp(s)                              # f32
        ebf = e.astype(bf16)

        # Un-normalised context, already head-concatenated: (nb, T, D).
        ctx = jax.lax.dot_general(ebf, v3, (((2,), (1,)), ((0,), (0,))),
                                  preferred_element_type=jnp.float32)
        # Per-head denominators broadcast to the D columns via the same mask.
        denom = jnp.dot(ebf.reshape(nb * T, HS), hmask.astype(bf16),
                        preferred_element_type=jnp.float32)       # (nb*T, D)
        ctx = ctx.reshape(nb * T, D) * pl.reciprocal(denom, approx=True)

        # Single output projection (no per-head accumulation).
        out = jnp.dot(ctx.astype(bf16), wo_ref[...],
                      preferred_element_type=jnp.float32) + bo_ref[...]
        o_ref[...] = out.reshape(nb, T, D).astype(o_ref.dtype)

    return kernel


def _grid_blocks(n: int) -> int:
    """1 grid step on single-TC chips (v5e/v6e); 2 parallel blocks on dual-TC v7x."""
    try:
        kind = jax.devices()[0].device_kind.lower()
    except Exception:
        kind = ""
    dual_tc = "v7" in kind
    # TODO(synk): on v7x, verify in a trace that the 2 "parallel" blocks land on
    # both TensorCores; otherwise switch to pl.core_map / CORE_PARALLEL.
    return 2 if (dual_tc and n >= 2 and n % 2 == 0) else 1


@functools.partial(jax.jit, static_argnames=("num_heads", "mask"))
def attention_layer(query, key, value, params, *, num_heads, mask=False):
    """Pallas implementation of AttentionLayer.forward.

    query: (B, Steps, T, D); key/value: (B, Steps, S, D). Returns (B, Steps, T, D).
    """
    wq, bq, wk, bk, wv, bv, wo, bo = params
    B, St, T, D = query.shape
    S = key.shape[-2]
    assert D % num_heads == 0
    head_dim = D // num_heads
    H = num_heads
    HS = H * S
    N = B * St

    grid_n = _grid_blocks(N)
    NB = N // grid_n

    q2 = query.reshape(N, T, D)
    # Tile K/V across heads in the wrapper (plain XLA, negligible bytes) so the
    # kernel can run all heads through single batched dot_generals.
    k_t = jnp.tile(key.reshape(N, S, D), (1, H, 1))      # (N, H*S, D)
    v_t = jnp.tile(value.reshape(N, S, D), (1, H, 1))    # (N, H*S, D)

    # Block-diagonal head mask: 1 where src-row block == model-dim head.
    j_blk = (jnp.arange(HS) // S)[:, None]
    c_blk = (jnp.arange(D) // head_dim)[None, :]
    head_mask = (j_blk == c_blk).astype(jnp.float32)     # (HS, D)

    # Causal bias in the tiled (T, H*S) score layout; finite -1e30, not -inf.
    if mask:
        t_idx = jnp.arange(T)[:, None]
        s_idx = (jnp.arange(HS) % S)[None, :]
        attn_bias = jnp.where(s_idx <= t_idx, 0.0, -1e30).astype(jnp.float32)
    else:
        attn_bias = jnp.zeros((T, HS), jnp.float32)

    # bf16 MXU operands (accumulation stays f32 inside the kernel).
    wq_b = wq.astype(jnp.bfloat16)
    wk_b = wk.astype(jnp.bfloat16)
    wv_b = wv.astype(jnp.bfloat16)
    wo_b = wo.astype(jnp.bfloat16)

    weight_spec = pl.BlockSpec((D, D), lambda i: (0, 0))     # VMEM-resident
    bias_spec = pl.BlockSpec((1, D), lambda i: (0, 0))

    out = pl.pallas_call(
        make_attention_kernel(head_dim),
        out_shape=jax.ShapeDtypeStruct((N, T, D), query.dtype),
        grid=(grid_n,),
        in_specs=[
            pl.BlockSpec((NB, T, D), lambda i: (i, 0, 0)),    # query block
            pl.BlockSpec((NB, HS, D), lambda i: (i, 0, 0)),   # tiled key block
            pl.BlockSpec((NB, HS, D), lambda i: (i, 0, 0)),   # tiled value block
            weight_spec, bias_spec,                           # FC_Q
            weight_spec, bias_spec,                           # FC_K
            weight_spec, bias_spec,                           # FC_V
            weight_spec, bias_spec,                           # out_proj
            pl.BlockSpec((HS, D), lambda i: (0, 0)),          # head mask
            pl.BlockSpec((T, HS), lambda i: (0, 0)),          # causal bias
        ],
        out_specs=pl.BlockSpec((NB, T, D), lambda i: (i, 0, 0)),
        compiler_params=pltpu.CompilerParams(
            dimension_semantics=("parallel",)),
    )(q2, k_t, v_t, wq_b, bq, wk_b, bk, wv_b, bv, wo_b, bo, head_mask, attn_bias)

    return out.reshape(B, St, T, D)


def reference_forward(query, key, value, params, *, num_heads, mask=False):
    """Pure-JAX f32 mirror of the PyTorch forward (same split/cat head semantics)."""
    wq, bq, wk, bk, wv, bv, wo, bo = params
    D = query.shape[-1]
    hd = D // num_heads
    T = query.shape[-2]
    S = key.shape[-2]

    q = query @ wq + bq[0]
    k = key @ wk + bk[0]
    v = value @ wv + bv[0]

    q = jnp.concatenate(jnp.split(q, num_heads, axis=-1), axis=0)
    k = jnp.concatenate(jnp.split(k, num_heads, axis=-1), axis=0)
    v = jnp.concatenate(jnp.split(v, num_heads, axis=-1), axis=0)

    score = q @ jnp.swapaxes(k, -1, -2) / (hd ** 0.5)
    if mask:
        m = jnp.tril(jnp.ones((T, S), dtype=bool))
        score = jnp.where(m, score, -jnp.inf)
    score = jax.nn.softmax(score, axis=-1)
    out = score @ v
    out = jnp.concatenate(jnp.split(out, num_heads, axis=0), axis=-1)
    return out @ wo + bo[0]


def init_params(key, model_dim):
    """Deterministic parameter init (shapes match nn.Linear(model_dim, model_dim))."""
    ks = jax.random.split(key, 8)
    bound = 1.0 / (model_dim ** 0.5)

    def lin(kw, kb):
        # PyTorch Linear stores W as (out, in); we pre-transpose to (in, out).
        w = jax.random.uniform(kw, (model_dim, model_dim), jnp.float32, -bound, bound)
        b = jax.random.uniform(kb, (1, model_dim), jnp.float32, -bound, bound)
        return w, b

    wq, bq = lin(ks[0], ks[1])
    wk, bk = lin(ks[2], ks[3])
    wv, bv = lin(ks[4], ks[5])
    wo, bo = lin(ks[6], ks[7])
    return (wq, bq, wk, bk, wv, bv, wo, bo)


if __name__ == "__main__":
    key = jax.random.PRNGKey(0)
    k_q, k_k, k_v, k_p = jax.random.split(key, 4)

    B, STEPS, TGT, SRC, MODEL_DIM, NUM_HEADS = 2, 3, 8, 10, 32, 8

    query = jax.random.normal(k_q, (B, STEPS, TGT, MODEL_DIM), jnp.float32)
    kv_key = jax.random.normal(k_k, (B, STEPS, SRC, MODEL_DIM), jnp.float32)
    value = jax.random.normal(k_v, (B, STEPS, SRC, MODEL_DIM), jnp.float32)

    params = init_params(k_p, MODEL_DIM)

    for use_mask in (False, True):
        out = attention_layer(query, kv_key, value, params,
                              num_heads=NUM_HEADS, mask=use_mask)
        out = jax.block_until_ready(out)

        ref = reference_forward(query, kv_key, value, params,
                                num_heads=NUM_HEADS, mask=use_mask)
        ref = jax.block_until_ready(ref)

        assert out.shape == (B, STEPS, TGT, MODEL_DIM), out.shape
        assert bool(jnp.all(jnp.isfinite(out)))
        err = float(jnp.max(jnp.abs(out - ref)))
        # MXU operands are bf16 (per perf review) with f32 accumulation; the
        # reference is pure f32, so the tolerance is widened slightly vs a
        # bit-exact f32 kernel.
        assert bool(jnp.allclose(out, ref, rtol=1e-2, atol=2e-2)), (use_mask, err)

    print("KERNEL_OK")
</pallas_src>

<mosaic_0001>
module attributes {stable_mosaic.version = 11 : i64} {
  func.func @kernel(%arg0: i32, %arg1: memref<6x8x32xf32, #tpu.memory_space<vmem>>, %arg2: memref<6x80x32xf32, #tpu.memory_space<vmem>>, %arg3: memref<6x80x32xf32, #tpu.memory_space<vmem>>, %arg4: memref<32x32xbf16, #tpu.memory_space<vmem>>, %arg5: memref<1x32xf32, #tpu.memory_space<vmem>>, %arg6: memref<32x32xbf16, #tpu.memory_space<vmem>>, %arg7: memref<1x32xf32, #tpu.memory_space<vmem>>, %arg8: memref<32x32xbf16, #tpu.memory_space<vmem>>, %arg9: memref<1x32xf32, #tpu.memory_space<vmem>>, %arg10: memref<32x32xbf16, #tpu.memory_space<vmem>>, %arg11: memref<1x32xf32, #tpu.memory_space<vmem>>, %arg12: memref<80x32xf32, #tpu.memory_space<vmem>>, %arg13: memref<8x80xf32, #tpu.memory_space<vmem>>, %arg14: memref<6x8x32xf32, #tpu.memory_space<vmem>>) attributes {dimension_semantics = [#tpu.dimension_semantics<parallel>], iteration_bounds = array<i64: 1>, scalar_prefetch = 0 : i64, scratch_operands = 0 : i64, tpu.core_type = #tpu.core_type<tc>, window_params = [{transform_indices = @transform_0, window_bounds = array<i64: 6, 8, 32>}, {transform_indices = @transform_1, window_bounds = array<i64: 6, 80, 32>}, {transform_indices = @transform_2, window_bounds = array<i64: 6, 80, 32>}, {pipeline_mode = #tpu.pipeline_mode<synchronous>, transform_indices = @transform_3, window_bounds = array<i64: 32, 32>}, {pipeline_mode = #tpu.pipeline_mode<synchronous>, transform_indices = @transform_4, window_bounds = array<i64: 1, 32>}, {pipeline_mode = #tpu.pipeline_mode<synchronous>, transform_indices = @transform_5, window_bounds = array<i64: 32, 32>}, {pipeline_mode = #tpu.pipeline_mode<synchronous>, transform_indices = @transform_6, window_bounds = array<i64: 1, 32>}, {pipeline_mode = #tpu.pipeline_mode<synchronous>, transform_indices = @transform_7, window_bounds = array<i64: 32, 32>}, {pipeline_mode = #tpu.pipeline_mode<synchronous>, transform_indices = @transform_8, window_bounds = array<i64: 1, 32>}, {pipeline_mode = #tpu.pipeline_mode<synchronous>, transform_indices = @transform_9, window_bounds = array<i64: 32, 32>}, {pipeline_mode = #tpu.pipeline_mode<synchronous>, transform_indices = @transform_10, window_bounds = array<i64: 1, 32>}, {pipeline_mode = #tpu.pipeline_mode<synchronous>, transform_indices = @transform_11, window_bounds = array<i64: 80, 32>}, {pipeline_mode = #tpu.pipeline_mode<synchronous>, transform_indices = @transform_12, window_bounds = array<i64: 8, 80>}, {transform_indices = @transform_13, window_bounds = array<i64: 6, 8, 32>}]} {
    %c0 = arith.constant 0 : index
    %c0_0 = arith.constant 0 : index
    %c0_1 = arith.constant 0 : index
    %0 = vector.load %arg1[%c0, %c0_0, %c0_1] : memref<6x8x32xf32, #tpu.memory_space<vmem>>, vector<6x8x32xf32>
    %1 = vector.shape_cast %0 : vector<6x8x32xf32> to vector<48x32xf32>
    %2 = arith.truncf %1 : vector<48x32xf32> to vector<48x32xbf16>
    %c0_2 = arith.constant 0 : index
    %c0_3 = arith.constant 0 : index
    %3 = vector.load %arg4[%c0_2, %c0_3] : memref<32x32xbf16, #tpu.memory_space<vmem>>, vector<32x32xbf16>
    %cst = arith.constant dense<0.000000e+00> : vector<48x32xf32>
    %4 = tpu.matmul %2, %3, %cst {dimension_numbers = #tpu.dot_dimension_numbers<[1], [0], [0], [1], [0, 0, 1, 1], [], []>} : vector<48x32xbf16>, vector<32x32xbf16>, vector<48x32xf32> -> vector<48x32xf32>
    %c0_4 = arith.constant 0 : index
    %c0_5 = arith.constant 0 : index
    %5 = vector.load %arg5[%c0_4, %c0_5] : memref<1x32xf32, #tpu.memory_space<vmem>>, vector<1x32xf32>
    %6 = vector.broadcast %5 : vector<1x32xf32> to vector<48x32xf32>
    %7 = arith.addf %4, %6 : vector<48x32xf32>
    %c0_6 = arith.constant 0 : index
    %c0_7 = arith.constant 0 : index
    %c0_8 = arith.constant 0 : index
    %8 = vector.load %arg2[%c0_6, %c0_7, %c0_8] : memref<6x80x32xf32, #tpu.memory_space<vmem>>, vector<6x80x32xf32>
    %9 = vector.shape_cast %8 : vector<6x80x32xf32> to vector<480x32xf32>
    %10 = arith.truncf %9 : vector<480x32xf32> to vector<480x32xbf16>
    %c0_9 = arith.constant 0 : index
    %c0_10 = arith.constant 0 : index
    %11 = vector.load %arg6[%c0_9, %c0_10] : memref<32x32xbf16, #tpu.memory_space<vmem>>, vector<32x32xbf16>
    %cst_11 = arith.constant dense<0.000000e+00> : vector<480x32xf32>
    %12 = tpu.matmul %10, %11, %cst_11 {dimension_numbers = #tpu.dot_dimension_numbers<[1], [0], [0], [1], [0, 0, 1, 1], [], []>} : vector<480x32xbf16>, vector<32x32xbf16>, vector<480x32xf32> -> vector<480x32xf32>
    %c0_12 = arith.constant 0 : index
    %c0_13 = arith.constant 0 : index
    %13 = vector.load %arg7[%c0_12, %c0_13] : memref<1x32xf32, #tpu.memory_space<vmem>>, vector<1x32xf32>
    %14 = vector.broadcast %13 : vector<1x32xf32> to vector<480x32xf32>
    %15 = arith.addf %12, %14 : vector<480x32xf32>
    %c0_14 = arith.constant 0 : index
    %c0_15 = arith.constant 0 : index
    %c0_16 = arith.constant 0 : index
    %16 = vector.load %arg3[%c0_14, %c0_15, %c0_16] : memref<6x80x32xf32, #tpu.memory_space<vmem>>, vector<6x80x32xf32>
    %17 = vector.shape_cast %16 : vector<6x80x32xf32> to vector<480x32xf32>
    %18 = arith.truncf %17 : vector<480x32xf32> to vector<480x32xbf16>
    %c0_17 = arith.constant 0 : index
    %c0_18 = arith.constant 0 : index
    %19 = vector.load %arg8[%c0_17, %c0_18] : memref<32x32xbf16, #tpu.memory_space<vmem>>, vector<32x32xbf16>
    %cst_19 = arith.constant dense<0.000000e+00> : vector<480x32xf32>
    %20 = tpu.matmul %18, %19, %cst_19 {dimension_numbers = #tpu.dot_dimension_numbers<[1], [0], [0], [1], [0, 0, 1, 1], [], []>} : vector<480x32xbf16>, vector<32x32xbf16>, vector<480x32xf32> -> vector<480x32xf32>
    %c0_20 = arith.constant 0 : index
    %c0_21 = arith.constant 0 : index
    %21 = vector.load %arg9[%c0_20, %c0_21] : memref<1x32xf32, #tpu.memory_space<vmem>>, vector<1x32xf32>
    %22 = vector.broadcast %21 : vector<1x32xf32> to vector<480x32xf32>
    %23 = arith.addf %20, %22 : vector<480x32xf32>
    %cst_22 = arith.constant 5.000000e-01 : f32
    %24 = vector.broadcast %cst_22 : f32 to vector<48x32xf32>
    %25 = arith.mulf %7, %24 : vector<48x32xf32>
    %c0_23 = arith.constant 0 : index
    %c0_24 = arith.constant 0 : index
    %26 = vector.load %arg12[%c0_23, %c0_24] : memref<80x32xf32, #tpu.memory_space<vmem>>, vector<80x32xf32>
    %27 = vector.shape_cast %15 : vector<480x32xf32> to vector<6x80x32xf32>
    %28 = vector.shape_cast %26 : vector<80x32xf32> to vector<1x80x32xf32>
    %29 = vector.broadcast %28 : vector<1x80x32xf32> to vector<6x80x32xf32>
    %30 = arith.mulf %27, %29 : vector<6x80x32xf32>
    %31 = arith.truncf %30 : vector<6x80x32xf32> to vector<6x80x32xbf16>
    %32 = vector.shape_cast %23 : vector<480x32xf32> to vector<6x80x32xf32>
    %33 = vector.shape_cast %26 : vector<80x32xf32> to vector<1x80x32xf32>
    %34 = vector.broadcast %33 : vector<1x80x32xf32> to vector<6x80x32xf32>
    %35 = arith.mulf %32, %34 : vector<6x80x32xf32>
    %36 = arith.truncf %35 : vector<6x80x32xf32> to vector<6x80x32xbf16>
    %37 = vector.shape_cast %25 : vector<48x32xf32> to vector<6x8x32xf32>
    %38 = arith.truncf %37 : vector<6x8x32xf32> to vector<6x8x32xbf16>
    %cst_25 = arith.constant dense<0.000000e+00> : vector<6x8x80xf32>
    %39 = tpu.matmul %38, %31, %cst_25 {dimension_numbers = #tpu.dot_dimension_numbers<[2], [2], [1], [1], [0, 0, 0, 1, 1, 1], [0], [0]>} : vector<6x8x32xbf16>, vector<6x80x32xbf16>, vector<6x8x80xf32> -> vector<6x8x80xf32>
    %c0_26 = arith.constant 0 : index
    %c0_27 = arith.constant 0 : index
    %40 = vector.load %arg13[%c0_26, %c0_27] : memref<8x80xf32, #tpu.memory_space<vmem>>, vector<8x80xf32>
    %41 = vector.shape_cast %40 : vector<8x80xf32> to vector<1x8x80xf32>
    %42 = vector.broadcast %41 : vector<1x8x80xf32> to vector<6x8x80xf32>
    %43 = arith.addf %39, %42 : vector<6x8x80xf32>
    %cst_28 = arith.constant dense<0xFF800000> : vector<6x8xf32>
    %44 = vector.multi_reduction <maximumf>, %43, %cst_28 [2] : vector<6x8x80xf32> to vector<6x8xf32>
    %45 = vector.shape_cast %44 : vector<6x8xf32> to vector<6x8x1xf32>
    %46 = vector.broadcast %45 : vector<6x8x1xf32> to vector<6x8x80xf32>
    %47 = arith.subf %43, %46 : vector<6x8x80xf32>
    %48 = math.exp %47 : vector<6x8x80xf32>
    %49 = arith.truncf %48 : vector<6x8x80xf32> to vector<6x8x80xbf16>
    %cst_29 = arith.constant dense<0.000000e+00> : vector<6x8x32xf32>
    %50 = tpu.matmul %49, %36, %cst_29 {dimension_numbers = #tpu.dot_dimension_numbers<[2], [1], [1], [2], [0, 0, 0, 1, 1, 2], [0], [0]>} : vector<6x8x80xbf16>, vector<6x80x32xbf16>, vector<6x8x32xf32> -> vector<6x8x32xf32>
    %51 = vector.shape_cast %49 : vector<6x8x80xbf16> to vector<48x80xbf16>
    %52 = arith.truncf %26 : vector<80x32xf32> to vector<80x32xbf16>
    %cst_30 = arith.constant dense<0.000000e+00> : vector<48x32xf32>
    %53 = tpu.matmul %51, %52, %cst_30 {dimension_numbers = #tpu.dot_dimension_numbers<[1], [0], [0], [1], [0, 0, 1, 1], [], []>} : vector<48x80xbf16>, vector<80x32xbf16>, vector<48x32xf32> -> vector<48x32xf32>
    %54 = vector.shape_cast %50 : vector<6x8x32xf32> to vector<48x32xf32>
    %55 = tpu.reciprocal %53 {approx = true} : vector<48x32xf32> -> vector<48x32xf32>
    %56 = arith.mulf %54, %55 : vector<48x32xf32>
    %57 = arith.truncf %56 : vector<48x32xf32> to vector<48x32xbf16>
    %c0_31 = arith.constant 0 : index
    %c0_32 = arith.constant 0 : index
    %58 = vector.load %arg10[%c0_31, %c0_32] : memref<32x32xbf16, #tpu.memory_space<vmem>>, vector<32x32xbf16>
    %cst_33 = arith.constant dense<0.000000e+00> : vector<48x32xf32>
    %59 = tpu.matmul %57, %58, %cst_33 {dimension_numbers = #tpu.dot_dimension_numbers<[1], [0], [0], [1], [0, 0, 1, 1], [], []>} : vector<48x32xbf16>, vector<32x32xbf16>, vector<48x32xf32> -> vector<48x32xf32>
    %c0_34 = arith.constant 0 : index
    %c0_35 = arith.constant 0 : index
    %60 = vector.load %arg11[%c0_34, %c0_35] : memref<1x32xf32, #tpu.memory_space<vmem>>, vector<1x32xf32>
    %61 = vector.broadcast %60 : vector<1x32xf32> to vector<48x32xf32>
    %62 = arith.addf %59, %61 : vector<48x32xf32>
    %63 = vector.shape_cast %62 : vector<48x32xf32> to vector<6x8x32xf32>
    %c0_36 = arith.constant 0 : index
    %c0_37 = arith.constant 0 : index
    %c0_38 = arith.constant 0 : index
    %64 = vector.load %arg14[%c0_36, %c0_37, %c0_38] : memref<6x8x32xf32, #tpu.memory_space<vmem>>, vector<6x8x32xf32>
    tpu.vector_store %arg14[%c0_36, %c0_37, %c0_38], %63 {strides = array<i32>} : memref<6x8x32xf32, #tpu.memory_space<vmem>>, vector<6x8x32xf32>,
    return
  }
  func.func @transform_0(%arg0: i32) -> (i32, i32, i32) {
    %c0_i32 = arith.constant 0 : i32
    %c0_i32_0 = arith.constant 0 : i32
    %c0_i32_1 = arith.constant 0 : i32
    return %arg0, %c0_i32, %c0_i32_0 : i32, i32, i32
  }
  func.func @transform_1(%arg0: i32) -> (i32, i32, i32) {
    %c0_i32 = arith.constant 0 : i32
    %c0_i32_0 = arith.constant 0 : i32
    %c0_i32_1 = arith.constant 0 : i32
    return %arg0, %c0_i32, %c0_i32_0 : i32, i32, i32
  }
  func.func @transform_2(%arg0: i32) -> (i32, i32, i32) {
    %c0_i32 = arith.constant 0 : i32
    %c0_i32_0 = arith.constant 0 : i32
    %c0_i32_1 = arith.constant 0 : i32
    return %arg0, %c0_i32, %c0_i32_0 : i32, i32, i32
  }
  func.func @transform_3(%arg0: i32) -> (i32, i32) {
    %c0_i32 = arith.constant 0 : i32
    %c0_i32_0 = arith.constant 0 : i32
    %c0_i32_1 = arith.constant 0 : i32
    return %c0_i32, %c0_i32_0 : i32, i32
  }
  func.func @transform_4(%arg0: i32) -> (i32, i32) {
    %c0_i32 = arith.constant 0 : i32
    %c0_i32_0 = arith.constant 0 : i32
    %c0_i32_1 = arith.constant 0 : i32
    return %c0_i32, %c0_i32_0 : i32, i32
  }
  func.func @transform_5(%arg0: i32) -> (i32, i32) {
    %c0_i32 = arith.constant 0 : i32
    %c0_i32_0 = arith.constant 0 : i32
    %c0_i32_1 = arith.constant 0 : i32
    return %c0_i32, %c0_i32_0 : i32, i32
  }
  func.func @transform_6(%arg0: i32) -> (i32, i32) {
    %c0_i32 = arith.constant 0 : i32
    %c0_i32_0 = arith.constant 0 : i32
    %c0_i32_1 = arith.constant 0 : i32
    return %c0_i32, %c0_i32_0 : i32, i32
  }
  func.func @transform_7(%arg0: i32) -> (i32, i32) {
    %c0_i32 = arith.constant 0 : i32
    %c0_i32_0 = arith.constant 0 : i32
    %c0_i32_1 = arith.constant 0 : i32
    return %c0_i32, %c0_i32_0 : i32, i32
  }
  func.func @transform_8(%arg0: i32) -> (i32, i32) {
    %c0_i32 = arith.constant 0 : i32
    %c0_i32_0 = arith.constant 0 : i32
    %c0_i32_1 = arith.constant 0 : i32
    return %c0_i32, %c0_i32_0 : i32, i32
  }
  func.func @transform_9(%arg0: i32) -> (i32, i32) {
    %c0_i32 = arith.constant 0 : i32
    %c0_i32_0 = arith.constant 0 : i32
    %c0_i32_1 = arith.constant 0 : i32
    return %c0_i32, %c0_i32_0 : i32, i32
  }
  func.func @transform_10(%arg0: i32) -> (i32, i32) {
    %c0_i32 = arith.constant 0 : i32
    %c0_i32_0 = arith.constant 0 : i32
    %c0_i32_1 = arith.constant 0 : i32
    return %c0_i32, %c0_i32_0 : i32, i32
  }
  func.func @transform_11(%arg0: i32) -> (i32, i32) {
    %c0_i32 = arith.constant 0 : i32
    %c0_i32_0 = arith.constant 0 : i32
    %c0_i32_1 = arith.constant 0 : i32
    return %c0_i32, %c0_i32_0 : i32, i32
  }
  func.func @transform_12(%arg0: i32) -> (i32, i32) {
    %c0_i32 = arith.constant 0 : i32
    %c0_i32_0 = arith.constant 0 : i32
    %c0_i32_1 = arith.constant 0 : i32
    return %c0_i32, %c0_i32_0 : i32, i32
  }
  func.func @transform_13(%arg0: i32) -> (i32, i32, i32) {
    %c0_i32 = arith.constant 0 : i32
    %c0_i32_0 = arith.constant 0 : i32
    %c0_i32_1 = arith.constant 0 : i32
    return %arg0, %c0_i32, %c0_i32_0 : i32, i32, i32
  }
}

</mosaic_0001>

<bundles_post_ra>
// kernel: attention_layer.1
= control target key start
LH: loop header
LB: loop body
LE: loop exit
PB: predicated region body
PF: predicated region fallthrough
CT: control target
= control target key end

     0   :  { %s3402_s0 = inlined_call_operand.vmem [shape: f32[6,8,32], index: 0, kind: input, shape index: {}]   ;;  %s3403_s1 = inlined_call_operand.vmem [shape: f32[6,80,32], index: 1, kind: input, shape index: {}]   ;;  %s3404_s2 = inlined_call_operand.vmem [shape: f32[6,80,32], index: 2, kind: input, shape index: {}]   ;;  %s3405_s3 = inlined_call_operand.vmem [shape: bf16[32,32], index: 3, kind: input, shape index: {}]   ;;  %s3406_s4 = inlined_call_operand.vmem [shape: f32[1,32], index: 4, kind: input, shape index: {}]   ;;  %s3407_s5 = inlined_call_operand.vmem [shape: bf16[32,32], index: 5, kind: input, shape index: {}]   ;;  %s3408_s6 = inlined_call_operand.vmem [shape: f32[1,32], index: 6, kind: input, shape index: {}]   ;;  %s3409_s7 = inlined_call_operand.vmem [shape: bf16[32,32], index: 7, kind: input, shape index: {}]   ;;  %s3410_s8 = inlined_call_operand.vmem [shape: f32[1,32], index: 8, kind: input, shape index: {}]   ;;  %s3411_s9 = inlined_call_operand.vmem [shape: bf16[32,32], index: 9, kind: input, shape index: {}]   ;;  %s3412_s10 = inlined_call_operand.vmem [shape: f32[1,32], index: 10, kind: input, shape index: {}]   ;;  %s3413_s11 = inlined_call_operand.vmem [shape: f32[80,32], index: 11, kind: input, shape index: {}]   ;;  %s3414_s12 = inlined_call_operand.vmem [shape: f32[8,80], index: 12, kind: input, shape index: {}]   ;;  %s3415_s13 = inlined_call_operand.hbm [shape: f32[6,8,32], index: 13, kind: output, shape index: {}]  }
   0x1   :  { %v2006_v0 = vld [vmem:[%s3407_s5 + $0x8] sm:$0xff]  ;;  %v2005_v1 = vld [vmem:[%s3407_s5] sm:$0xff] }
   0x2   :  { %315 = vmatpush.bf16.msra.mxu1 %v2006_v0  ;;  %v109_v2 = vld [vmem:[%s3403_s1] sm:$0xff]  ;;  %v110_v3 = vld [vmem:[%s3403_s1 + $0x8] sm:$0xff]  ;;  %2011 = vmatpush.bf16.msra.mxu3 %v2006_v0 }
   0x3   :  { %18 = vsyncpa [#allocation3], 0  ;;  %v169_v4 = vpack.c.bf16 %v110_v3, %v109_v2  ;;  %vm75_vm0 = vcmask 261120   ;;  %v111_v5 = vld [vmem:[%s3403_s1 + $0x10] sm:$0xff]  ;;  %v112_v6 = vld [vmem:[%s3403_s1 + $0x18] sm:$0xff]  ;;  %vm1426_vm1 = vcmask 654336  }
   0x4   :  { %v170_v7 = vpack.c.bf16 %v112_v6, %v111_v5  ;;  %v113_v8 = vld [vmem:[%s3403_s1 + $0x20] sm:$0xff]  ;;  %v114_v9 = vld [vmem:[%s3403_s1 + $0x28] sm:$0xff]  ;;  %v115_v11 = vld [vmem:[%s3403_s1 + $0x30] sm:$0xff]  ;;  %s1878_s30 = sshll.u32 %s3415_s13, 4  ;;  %s2085_s14 = smov 128   ;;  %s1879_s30 = int_to_ptr.hbm [resolvable:$true] %s1878_s30 }
   0x5   :  { %v171_v10 = vpack.c.bf16 %v114_v9, %v113_v8  ;;  %v116_v12 = vld [vmem:[%s3403_s1 + $0x38] sm:$0xff]  ;;  %v117_v14 = vld [vmem:[%s3403_s1 + $0x40] sm:$0xff]  ;;  %v118_v15 = vld [vmem:[%s3403_s1 + $0x48] sm:$0xff]  ;;  %s2086_s15 = smov 8  }
   0x6   :  { %316 = vmatpush.bf16.msra.mxu1 %v2005_v1  ;;  %2012 = vmatpush.bf16.msra.mxu3 %v2005_v1  ;;  %v172_v13 = vpack.c.bf16 %v116_v12, %v115_v11  ;;  %v173_v16 = vpack.c.bf16 %v118_v15, %v117_v14  ;;  %v119_v17 = vld [vmem:[%s3403_s1 + $0x50] sm:$0xff]  ;;  %v120_v18 = vld [vmem:[%s3403_s1 + $0x58] sm:$0xff]  ;;  %v121_v20 = vld [vmem:[%s3403_s1 + $0x60] sm:$0xff] }
   0x7   :  { %v174_v19 = vpack.c.bf16 %v120_v18, %v119_v17  ;;  %v122_v21 = vld [vmem:[%s3403_s1 + $0x68] sm:$0xff]  ;;  %v123_v23 = vld [vmem:[%s3403_s1 + $0x70] sm:$0xff]  ;;  %v124_v24 = vld [vmem:[%s3403_s1 + $0x78] sm:$0xff] }
   0x8   :  { %v175_v22 = vpack.c.bf16 %v122_v21, %v121_v20  ;;  %v176_v25 = vpack.c.bf16 %v124_v24, %v123_v23  ;;  %v125_v26 = vld [vmem:[%s3403_s1 + $0x80] sm:$0xff]  ;;  %v126_v27 = vld [vmem:[%s3403_s1 + $0x88] sm:$0xff]  ;;  %v127_v39 = vld [vmem:[%s3403_s1 + $0x90] sm:$0xff] }
   0x9   :  { %1909 = vmatmul.msk.bf16.vlgmr.msra.gmra.mxu1 %vm75_vm0, %v169_v4  ;;  %v2228_v28 = vld [vmem:[%s3408_s6] ss:$0 sm:$0xff]  ;;  %v177_v29 = vpack.c.bf16 %v126_v27, %v125_v26  ;;  %v2241_v35 = vld [vmem:[%s3413_s11 + $0x8] sm:$0xff]  ;;  %v128_v40 = vld [vmem:[%s3403_s1 + $0x98] sm:$0xff] }
   0xa   :  { %v2235_v32 = vld [vmem:[%s3413_s11] sm:$0xff]  ;;  %v178_v43 = vpack.c.bf16 %v128_v40, %v127_v39  ;;  %v2262_v48 = vld [vmem:[%s3413_s11 + $0x10] sm:$0xff]  ;;  %v2268_v51 = vld [vmem:[%s3413_s11 + $0x18] sm:$0xff] }
   0xb   :  { %v129_v55 = vld [vmem:[%s3403_s1 + $0xa0] sm:$0xff]  ;;  %v130_v56 = vld [vmem:[%s3403_s1 + $0xa8] sm:$0xff]  ;;  %v131_v0 = vld [vmem:[%s3403_s1 + $0xb0] sm:$0xff] }
   0xc   :  { %v179_v59 = vpack.c.bf16 %v130_v56, %v129_v55  ;;  %v132_v1 = vld [vmem:[%s3403_s1 + $0xb8] sm:$0xff]  ;;  %v2004_v5 = vld [vmem:[%s3405_s3 + $0x8] sm:$0xff]  ;;  %v133_v6 = vld [vmem:[%s3403_s1 + $0xc0] sm:$0xff] }
   0xd   :  { %v180_v2 = vpack.c.bf16 %v132_v1, %v131_v0  ;;  %91 = vmatpush.bf16.msra.mxu0 %v2004_v5  ;;  %v2003_v8 = vld [vmem:[%s3405_s3] sm:$0xff]  ;;  %v47_v12 = vld [vmem:[%s3402_s0 + $0x8] sm:$0xff]  ;;  %v2323_v18 = vld [vmem:[%s3413_s11 + $0x38] sm:$0xff] }
   0xe   :  { %v46_v11 = vld [vmem:[%s3402_s0] sm:$0xff]  ;;  %v2328_v20 = vld [vmem:[%s3413_s11 + $0x48] sm:$0xff]  ;;  %v2335_v23 = vld [vmem:[%s3413_s11 + $0x30] sm:$0xff] }
   0xf   :  { %v2316_v15 = vld [vmem:[%s3413_s11 + $0x40] sm:$0xff]  ;;  %v155_v27 = vld [vmem:[%s3403_s1 + $0x170] sm:$0xff] }
  0x11   :  { %92 = vmatpush.bf16.msra.mxu0 %v2003_v8 }
  0x19   :  { %1910 = vmatmul.msk.bf16.gmra.mxu1 %vm75_vm0, %v170_v7  ;;  %v134_v7 = vld [vmem:[%s3403_s1 + $0xc8] sm:$0xff] }
  0x1a   :  { %v181_v9 = vpack.c.bf16 %v134_v7, %v133_v6 }
  0x29   :  { %1911 = vmatmul.msk.bf16.gmra.mxu1 %vm75_vm0, %v171_v10 }
  0x39   :  { %1912 = vmatmul.msk.bf16.gmra.mxu1 %vm75_vm0, %v172_v13  ;;  %v52_v13 = vpack.c.bf16 %v47_v12, %v46_v11 }
  0x3b   :  { %1898 = vmatmul.msk.bf16.vlgmr.msra.gmra.mxu0 %vm75_vm0, %v52_v13  ;;  %v157_v13 = vld [vmem:[%s3403_s1 + $0x180] sm:$0xff] }
  0x49   :  { %1913 = vmatmul.msk.bf16.gmra.mxu1 %vm75_vm0, %v173_v16 }
  0x59   :  { %1914 = vmatmul.msk.bf16.gmra.mxu1 %vm75_vm0, %v174_v19 }
  0x69   :  { %1915 = vmatmul.msk.bf16.gmra.mxu1 %vm75_vm0, %v175_v22 }
  0x79   :  { %1916 = vmatmul.msk.bf16.gmra.mxu1 %vm75_vm0, %v176_v25 }
  0x86   :  { %v318_v30 = vpop.f32.mrf.mxu1 }
  0x87   :  { %v319_v31 = vadd.f32 %v2228_v28, %v318_v30  ;;  %v135_v30 = vld [vmem:[%s3403_s1 + $0xd0] sm:$0xff] }
  0x89   :  { %1917 = vmatmul.msk.bf16.gmra.mxu1 %vm75_vm0, %v177_v29  ;;  %v843_v33 = vmul.f32 %v2235_v32, %v319_v31  ;;  %v156_v29 = vld [vmem:[%s3403_s1 + $0x178] sm:$0xff] }
  0x8a   :  { %v136_v31 = vld [vmem:[%s3403_s1 + $0xd8] sm:$0xff] }
  0x8b   :  { %v903_v37 = vpack.c.bf16 %v843_v33, %v843_v33  ;;  %v192_v33 = vpack.c.bf16 %v156_v29, %v155_v27 }
  0x8d   :  { %v2251_v42 = vunpack.c.l.b16 %v903_v37  ;;  %1932 = vmatmul.msk.bf16.vlgmr.msra.gmra.mxu3 %vm75_vm0, %v192_v33 }
  0x8e   :  { %v320_v34 = vpop.f32.mrf.mxu1 }
  0x8f   :  { %v321_v36 = vadd.f32 %v2228_v28, %v320_v34 }
  0x91   :  { %v844_v38 = vmul.f32 %v2241_v35, %v321_v36 }
  0x93   :  { %v904_v41 = vpack.c.bf16 %v844_v38, %v844_v38  ;;  %v2008_v38 = vld [vmem:[%s3409_s7 + $0x8] sm:$0xff] }
  0x94   :  { %2013 = vmatpush.bf16.msra.mxu2 %v2008_v38  ;;  %674 = vmatpush.bf16.msrb.mxu0 %v2008_v38 }
  0x95   :  { %v2253_v44 = vunpack.c.l.b16 %v904_v41  ;;  %v182_v41 = vpack.c.bf16 %v136_v31, %v135_v30 }
  0x96   :  { %v323_v45 = vpop.f32.mrf.mxu1 }
  0x97   :  { %v1110_v46 = vpack.c.b16 %v2253_v44, %v2251_v42  ;;  %v324_v47 = vadd.f32 %v2228_v28, %v323_v45  ;;  %v2360_v45 = vld [vmem:[%s3413_s11 + $0x28] sm:$0xff]  ;;  %v161_v42 = vld [vmem:[%s3403_s1 + $0x1a0] sm:$0xff] }
  0x98   :  { %v162_v44 = vld [vmem:[%s3403_s1 + $0x1a8] sm:$0xff] }
  0x99   :  { %1918 = vmatmul.msk.bf16.gmra.mxu1 %vm75_vm0, %v178_v43  ;;  %v845_v49 = vmul.f32 %v2262_v48, %v324_v47 }
  0x9b   :  { %v905_v53 = vpack.c.bf16 %v845_v49, %v845_v49 }
  0x9d   :  { %v2278_v58 = vunpack.c.l.b16 %v905_v53  ;;  %v2366_v53 = vld [vmem:[%s3413_s11 + $0x20] sm:$0xff] }
  0x9e   :  { %v325_v50 = vpop.f32.mrf.mxu1 }
  0x9f   :  { %v326_v52 = vadd.f32 %v2228_v28, %v325_v50 }
  0xa1   :  { %v846_v54 = vmul.f32 %v2268_v51, %v326_v52 }
  0xa3   :  { %v906_v57 = vpack.c.bf16 %v846_v54, %v846_v54  ;;  %v2007_v54 = vld [vmem:[%s3409_s7] sm:$0xff] }
  0xa4   :  { %2014 = vmatpush.bf16.msra.mxu2 %v2007_v54  ;;  %675 = vmatpush.bf16.msrb.mxu0 %v2007_v54  ;;  %v140_v54 = vld [vmem:[%s3403_s1 + $0xf8] sm:$0xff] }
  0xa5   :  { %v2280_v60 = vunpack.c.l.b16 %v906_v57 }
  0xa6   :  { %v328_v61 = vpop.f32.mrf.mxu1 }
  0xa7   :  { %v1111_v62 = vpack.c.b16 %v2280_v60, %v2278_v58  ;;  %v329_v49 = vadd.f32 %v2228_v28, %v328_v61  ;;  %v482_v61 = vld [vmem:[%s3404_s2 + $0x70] sm:$0xff] }
  0xa9   :  { %1919 = vmatmul.msk.bf16.gmra.mxu1 %vm75_vm0, %v179_v59  ;;  %v847_v0 = vmul.f32 %v2366_v53, %v329_v49  ;;  %v159_v49 = vld [vmem:[%s3403_s1 + $0x190] sm:$0xff] }
  0xab   :  { %v907_v7 = vpack.c.bf16 %v847_v0, %v847_v0  ;;  %v1119_v0 = vsel %vm75_vm0, %v1110_v46, 0  ;;  %v141_v46 = vld [vmem:[%s3403_s1 + $0x100] sm:$0xff] }
  0xae   :  { %v330_v63 = vpop.f32.mrf.mxu1 }
  0xaf   :  { %v331_v37 = vadd.f32 %v2228_v28, %v330_v63  ;;  %v483_v63 = vld [vmem:[%s3404_s2 + $0x78] sm:$0xff] }
  0xb1   :  { %v848_v55 = vmul.f32 %v2360_v45, %v331_v37 }
  0xb6   :  { %v333_v3 = vpop.f32.mrf.mxu1 }
  0xb7   :  { %v334_v21 = vadd.f32 %v2228_v28, %v333_v3  ;;  %v908_v3 = vpack.c.bf16 %v848_v55, %v848_v55 }
  0xb9   :  { %1920 = vmatmul.msk.bf16.gmra.mxu1 %vm75_vm0, %v180_v2  ;;  %v849_v34 = vmul.f32 %v2335_v23, %v334_v21  ;;  %v535_v2 = vpack.c.bf16 %v483_v63, %v482_v61  ;;  %v1105_v12 = vunpack.c.l.b16 %v908_v3  ;;  %v1104_v21 = vunpack.c.l.b16 %v907_v7  ;;  %v48_v61 = vld [vmem:[%s3402_s0 + $0x10] sm:$0xff]  ;;  %v49_v63 = vld [vmem:[%s3402_s0 + $0x18] sm:$0xff] }
  0xba   :  { %v487_v3 = vld [vmem:[%s3404_s2 + $0x98] sm:$0xff]  ;;  %v195_v7 = vpack.c.bf16 %v162_v44, %v161_v42 }
  0xbb   :  { %v909_v50 = vpack.c.bf16 %v849_v34, %v849_v34  ;;  %1954 = vmatmul.msk.bf16.vlgmr.msra.gmra.mxu2 %vm75_vm0, %v535_v2  ;;  %v1112_v27 = vpack.c.b16 %v1105_v12, %v1104_v21  ;;  %v484_v34 = vld [vmem:[%s3404_s2 + $0x80] sm:$0xff]  ;;  %v486_v2 = vld [vmem:[%s3404_s2 + $0x90] sm:$0xff]  ;;  %v164_v21 = vld [vmem:[%s3403_s1 + $0x1b8] sm:$0xff] }
  0xbd   :  { %v1106_v1 = vunpack.c.l.b16 %v909_v50  ;;  %v1125_v33 = vsel %vm75_vm0, %v1112_v27, 0  ;;  %v160_v50 = vld [vmem:[%s3403_s1 + $0x198] sm:$0xff] }
  0xbe   :  { %v335_v4 = vpop.f32.mrf.mxu1  ;;  %v194_v58 = vpack.c.bf16 %v160_v50, %v159_v49 }
  0xbf   :  { %v336_v16 = vadd.f32 %v2228_v28, %v335_v4 }
  0xc1   :  { %v850_v24 = vmul.f32 %v2323_v18, %v336_v16  ;;  %v137_v16 = vld [vmem:[%s3403_s1 + $0xe0] sm:$0xff] }
  0xc3   :  { %v910_v39 = vpack.c.bf16 %v850_v24, %v850_v24 }
  0xc5   :  { %v1107_v59 = vunpack.c.l.b16 %v910_v39 }
  0xc6   :  { %v338_v10 = vpop.f32.mrf.mxu1 }
  0xc7   :  { %v339_v14 = vadd.f32 %v2228_v28, %v338_v10  ;;  %v1113_v5 = vpack.c.b16 %v1107_v59, %v1106_v1  ;;  %v53_v1 = vpack.c.bf16 %v49_v63, %v48_v61  ;;  %v145_v61 = vld [vmem:[%s3403_s1 + $0x120] sm:$0xff]  ;;  %v146_v63 = vld [vmem:[%s3403_s1 + $0x128] sm:$0xff] }
  0xc9   :  { %1921 = vmatmul.msk.bf16.gmra.mxu1 %vm75_vm0, %v181_v9  ;;  %v851_v17 = vmul.f32 %v2316_v15, %v339_v14  ;;  %v1128_v11 = vsel %vm75_vm0, %v1113_v5, 0  ;;  %v158_v14 = vld [vmem:[%s3403_s1 + $0x188] sm:$0xff]  ;;  %1899 = vmatmul.msk.bf16.gmra.mxu0 %vm75_vm0, %v53_v1 }
  0xcb   :  { %v911_v25 = vpack.c.bf16 %v851_v17, %v851_v17  ;;  %v138_v17 = vld [vmem:[%s3403_s1 + $0xe8] sm:$0xff] }
  0xcd   :  { %v1108_v40 = vunpack.c.l.b16 %v911_v25 }
  0xce   :  { %v340_v19 = vpop.f32.mrf.mxu1 }
  0xcf   :  { %v341_v22 = vadd.f32 %v2228_v28, %v340_v19  ;;  %v193_v19 = vpack.c.bf16 %v158_v14, %v157_v13  ;;  %v488_v13 = vld [vmem:[%s3404_s2 + $0xa0] sm:$0xff]  ;;  %v489_v14 = vld [vmem:[%s3404_s2 + $0xa8] sm:$0xff] }
  0xd1   :  { %v852_v26 = vmul.f32 %v2328_v20, %v341_v22  ;;  %1933 = vmatmul.msk.bf16.gmra.mxu3 %vm75_vm0, %v193_v19  ;;  %v163_v19 = vld [vmem:[%s3403_s1 + $0x1b0] sm:$0xff] }
  0xd2   :  { %v196_v27 = vpack.c.bf16 %v164_v21, %v163_v19 }
  0xd3   :  { %v912_v36 = vpack.c.bf16 %v852_v26, %v852_v26  ;;  %v183_v26 = vpack.c.bf16 %v138_v17, %v137_v16  ;;  %v538_v16 = vpack.c.bf16 %v489_v14, %v488_v13 }
  0xd5   :  { %v1109_v43 = vunpack.c.l.b16 %v912_v36  ;;  %v485_v36 = vld [vmem:[%s3404_s2 + $0x88] sm:$0xff] }
  0xd6   :  { %v343_v47 = vpop.f32.mrf.mxu1  ;;  %v536_v37 = vpack.c.bf16 %v485_v36, %v484_v34  ;;  %v469_v34 = vld [vmem:[%s3404_s2 + $0x8] sm:$0xff] }
  0xd7   :  { %v1114_v52 = vpack.c.b16 %v1109_v43, %v1108_v40  ;;  %v344_v56 = vadd.f32 %v2228_v28, %v343_v47  ;;  %v1122_v47 = vsel %vm75_vm0, %v1111_v62, 0 }
  0xd8   :  { %1955 = vmatmul.msk.bf16.gmra.mxu2 %vm75_vm0, %v536_v37 }
  0xd9   :  { %1922 = vmatmul.msk.bf16.gmra.mxu1 %vm75_vm0, %v182_v41  ;;  %v1131_v57 = vsel %vm75_vm0, %v1114_v52, 0  ;;  %v853_v4 = vmul.f32 %v2235_v32, %v344_v56  ;;  %v139_v52 = vld [vmem:[%s3403_s1 + $0xf0] sm:$0xff] }
  0xda   :  { %1136 = vmatpush.bf16.xpose.msrb.mxu3 %v1131_v57  ;;  %v184_v56 = vpack.c.bf16 %v140_v54, %v139_v52 }
  0xdb   :  { %v913_v9 = vpack.c.bf16 %v853_v4, %v853_v4  ;;  %v537_v4 = vpack.c.bf16 %v487_v3, %v486_v2 }
  0xdd   :  { %v2400_v24 = vunpack.c.l.b16 %v913_v9 }
  0xde   :  { %v345_v6 = vpop.f32.mrf.mxu1 }
  0xdf   :  { %v346_v8 = vadd.f32 %v2228_v28, %v345_v6  ;;  %v142_v6 = vld [vmem:[%s3403_s1 + $0x108] sm:$0xff] }
  0xe1   :  { %v854_v10 = vmul.f32 %v2241_v35, %v346_v8  ;;  %1934 = vmatmul.msk.bf16.gmra.mxu3 %vm75_vm0, %v194_v58  ;;  %v185_v8 = vpack.c.bf16 %v142_v6, %v141_v46  ;;  %v187_v46 = vpack.c.bf16 %v146_v63, %v145_v61 }
  0xe2   :  { %1137 = vmatpush.bf16.xpose.msrb.mxu3 %v1128_v11  ;;  %v51_v11 = vld [vmem:[%s3402_s0 + $0x28] sm:$0xff] }
  0xe3   :  { %v914_v22 = vpack.c.bf16 %v854_v10, %v854_v10  ;;  %v50_v10 = vld [vmem:[%s3402_s0 + $0x20] sm:$0xff] }
  0xe4   :  { %v54_v12 = vpack.c.bf16 %v51_v11, %v50_v10  ;;  %v470_v11 = vld [vmem:[%s3404_s2 + $0x10] sm:$0xff] }
  0xe5   :  { %v2402_v25 = vunpack.c.l.b16 %v914_v22  ;;  %v143_v22 = vld [vmem:[%s3403_s1 + $0x110] sm:$0xff] }
  0xe6   :  { %v348_v29 = vpop.f32.mrf.mxu1  ;;  %1900 = vmatmul.msk.bf16.gmra.mxu0 %vm75_vm0, %v54_v12 }
  0xe7   :  { %v1166_v30 = vpack.c.b16 %v2402_v25, %v2400_v24  ;;  %v349_v31 = vadd.f32 %v2228_v28, %v348_v29  ;;  %v151_v25 = vld [vmem:[%s3403_s1 + $0x150] sm:$0xff] }
  0xe8   :  { %1956 = vmatmul.msk.bf16.gmra.mxu2 %vm75_vm0, %v537_v4 }
  0xe9   :  { %1923 = vmatmul.msk.bf16.gmra.mxu1 %vm75_vm0, %v183_v26  ;;  %v855_v38 = vmul.f32 %v2262_v48, %v349_v31  ;;  %v144_v26 = vld [vmem:[%s3403_s1 + $0x118] sm:$0xff] }
  0xea   :  { %1138 = vmatpush.bf16.xpose.msrb.mxu3 %v1125_v33  ;;  %v186_v29 = vpack.c.bf16 %v144_v26, %v143_v22  ;;  %v468_v33 = vld [vmem:[%s3404_s2] sm:$0xff] }
  0xeb   :  { %v915_v41 = vpack.c.bf16 %v855_v38, %v855_v38  ;;  %v528_v37 = vpack.c.bf16 %v469_v34, %v468_v33  ;;  %v490_v38 = vld [vmem:[%s3404_s2 + $0xb0] sm:$0xff] }
  0xed   :  { %v2436_v62 = vunpack.c.l.b16 %v915_v41 }
  0xee   :  { %v350_v39 = vpop.f32.mrf.mxu1 }
  0xef   :  { %v351_v40 = vadd.f32 %v2228_v28, %v350_v39  ;;  %v491_v39 = vld [vmem:[%s3404_s2 + $0xb8] sm:$0xff] }
  0xf1   :  { %v856_v43 = vmul.f32 %v2268_v51, %v351_v40  ;;  %1935 = vmatmul.msk.bf16.gmra.mxu3 %vm75_vm0, %v195_v7  ;;  %v539_v40 = vpack.c.bf16 %v491_v39, %v490_v38 }
  0xf2   :  { %1139 = vmatpush.bf16.xpose.msrb.mxu3 %v1122_v47 }
  0xf3   :  { %v916_v60 = vpack.c.bf16 %v856_v43, %v856_v43 }
  0xf5   :  { %v2438_v55 = vunpack.c.l.b16 %v916_v60  ;;  %v165_v60 = vld [vmem:[%s3403_s1 + $0x1c0] sm:$0xff] }
  0xf6   :  { %v2440_v57 = vpop.f32.mrf.mxu1  ;;  %1947 = vmatmul.msk.bf16.vlgmr.msrb.gmra.mxu0 %vm75_vm0, %v528_v37 }
  0xf7   :  { %v1167_v59 = vpack.c.b16 %v2438_v55, %v2436_v62  ;;  %v354_v7 = vadd.f32 %v2228_v28, %v2440_v57  ;;  %v2622_v62 = vld [vmem:[%s3406_s4] ss:$0 sm:$0xff] }
  0xf8   :  { %1957 = vmatmul.msk.bf16.gmra.mxu2 %vm75_vm0, %v538_v16  ;;  %v492_v16 = vld [vmem:[%s3404_s2 + $0xc0] sm:$0xff] }
  0xf9   :  { %1924 = vmatmul.msk.bf16.gmra.mxu1 %vm75_vm0, %v184_v56  ;;  %v166_v56 = vld [vmem:[%s3403_s1 + $0x1c8] sm:$0xff]  ;;  %v857_v19 = vmul.f32 %v2366_v53, %v354_v7 }
  0xfa   :  { %1140 = vmatpush.bf16.xpose.msrb.mxu3 %v1119_v0  ;;  %v197_v0 = vpack.c.bf16 %v166_v56, %v165_v60 }
  0xfb   :  { %v917_v33 = vpack.c.bf16 %v857_v19, %v857_v19 }
  0xfe   :  { %v355_v5 = vpop.f32.mrf.mxu1 }
  0xff   :  { %v356_v3 = vadd.f32 %v2228_v28, %v355_v5  ;;  %v471_v5 = vld [vmem:[%s3404_s2 + $0x18] sm:$0xff] }
 0x100   :  { %v529_v57 = vpack.c.bf16 %v471_v5, %v470_v11  ;;  %v1178_v11 = vsel %vm75_vm0, %v1167_v59, 0  ;;  %v149_v5 = vld [vmem:[%s3403_s1 + $0x140] sm:$0xff]  ;;  %v94_v59 = vpop.f32.mrf.mxu0 }
 0x101   :  { %1936 = vmatmul.msk.bf16.gmra.mxu3 %vm75_vm0, %v196_v27  ;;  %v858_v10 = vmul.f32 %v2360_v45, %v356_v3 }
 0x103   :  { %v918_v26 = vpack.c.bf16 %v858_v10, %v858_v10 }
 0x106   :  { %v358_v9 = vpop.f32.mrf.mxu1  ;;  %1948 = vmatmul.msk.bf16.gmra.mxu0 %vm75_vm0, %v529_v57 }
 0x107   :  { %v359_v49 = vadd.f32 %v2228_v28, %v358_v9 }
 0x108   :  { %1958 = vmatmul.msk.bf16.gmra.mxu2 %vm75_vm0, %v539_v40  ;;  %v167_v40 = vld [vmem:[%s3403_s1 + $0x1d0] sm:$0xff] }
 0x109   :  { %1925 = vmatmul.msk.bf16.gmra.mxu1 %vm75_vm0, %v185_v8  ;;  %v859_v1 = vmul.f32 %v2335_v23, %v359_v49 }
 0x10b   :  { %v919_v8 = vpack.c.bf16 %v859_v1, %v859_v1  ;;  %v473_v1 = vld [vmem:[%s3404_s2 + $0x28] sm:$0xff] }
 0x10d   :  { %v1162_v21 = vunpack.c.l.b16 %v919_v8 }
 0x10e   :  { %v360_v17 = vpop.f32.mrf.mxu1 }
 0x10f   :  { %v361_v41 = vadd.f32 %v2228_v28, %v360_v17  ;;  %v493_v17 = vld [vmem:[%s3404_s2 + $0xc8] sm:$0xff] }
 0x110   :  { %v540_v22 = vpack.c.bf16 %v493_v17, %v492_v16  ;;  %v95_v17 = vadd.f32 %v2622_v62, %v94_v59 }
 0x111   :  { %v860_v52 = vmul.f32 %v2323_v18, %v361_v41  ;;  %1937 = vmatmul.msk.bf16.gmra.mxu3 %vm75_vm0, %v197_v0  ;;  %v168_v41 = vld [vmem:[%s3403_s1 + $0x1d8] sm:$0xff]  ;;  %v472_v0 = vld [vmem:[%s3404_s2 + $0x20] sm:$0xff] }
 0x112   :  { %v198_v49 = vpack.c.bf16 %v168_v41, %v167_v40  ;;  %v476_v40 = vld [vmem:[%s3404_s2 + $0x40] sm:$0xff]  ;;  %v477_v41 = vld [vmem:[%s3404_s2 + $0x48] sm:$0xff] }
 0x113   :  { %v920_v4 = vpack.c.bf16 %v860_v52, %v860_v52 }
 0x115   :  { %v1163_v12 = vunpack.c.l.b16 %v920_v4  ;;  %v530_v4 = vpack.c.bf16 %v473_v1, %v472_v0  ;;  %v154_v0 = vld [vmem:[%s3403_s1 + $0x168] sm:$0xff] }
 0x116   :  { %v363_v31 = vpop.f32.mrf.mxu1 }
 0x117   :  { %v364_v36 = vadd.f32 %v2228_v28, %v363_v31  ;;  %1949 = vmatmul.msk.bf16.gmra.mxu0 %vm75_vm0, %v530_v4 }
 0x118   :  { %1959 = vmatmul.msk.bf16.gmra.mxu2 %vm75_vm0, %v540_v22  ;;  %v475_v22 = vld [vmem:[%s3404_s2 + $0x38] sm:$0xff] }
 0x119   :  { %1926 = vmatmul.msk.bf16.gmra.mxu1 %vm75_vm0, %v186_v29  ;;  %v861_v43 = vmul.f32 %v2316_v15, %v364_v36  ;;  %v1169_v29 = vpack.c.b16 %v1163_v12, %v1162_v21  ;;  %v1161_v36 = vunpack.c.l.b16 %v918_v26  ;;  %v150_v12 = vld [vmem:[%s3403_s1 + $0x148] sm:$0xff]  ;;  %v474_v21 = vld [vmem:[%s3404_s2 + $0x30] sm:$0xff]  ;;  %v1175_v26 = vsel %vm75_vm0, %v1166_v30, 0  ;;  %v152_v30 = vld [vmem:[%s3403_s1 + $0x158] sm:$0xff] }
 0x11a   :  { %v189_v16 = vpack.c.bf16 %v150_v12, %v149_v5  ;;  %v2697_v12 = vpop.f32.mrf.mxu0 }
 0x11b   :  { %v921_v54 = vpack.c.bf16 %v861_v43, %v861_v43  ;;  %v1184_v39 = vsel %vm75_vm0, %v1169_v29, 0  ;;  %v147_v43 = vld [vmem:[%s3403_s1 + $0x130] sm:$0xff]  ;;  %v531_v29 = vpack.c.bf16 %v475_v22, %v474_v21 }
 0x11d   :  { %v1164_v42 = vunpack.c.l.b16 %v921_v54 }
 0x11e   :  { %v365_v47 = vpop.f32.mrf.mxu1 }
 0x11f   :  { %v366_v50 = vadd.f32 %v2228_v28, %v365_v47  ;;  %v148_v47 = vld [vmem:[%s3403_s1 + $0x138] sm:$0xff] }
 0x120   :  { %v188_v60 = vpack.c.bf16 %v148_v47, %v147_v43  ;;  %v532_v43 = vpack.c.bf16 %v477_v41, %v476_v40  ;;  %v498_v47 = vld [vmem:[%s3404_s2 + $0xf0] sm:$0xff] }
 0x121   :  { %v862_v58 = vmul.f32 %v2328_v20, %v366_v50  ;;  %v1160_v50 = vunpack.c.l.b16 %v917_v33  ;;  %1938 = vmatmul.msk.bf16.gmra.mxu3 %vm75_vm0, %v198_v49  ;;  %v497_v33 = vld [vmem:[%s3404_s2 + $0xe8] sm:$0xff]  ;;  %v499_v49 = vld [vmem:[%s3404_s2 + $0xf8] sm:$0xff] }
 0x123   :  { %v922_v2 = vpack.c.bf16 %v862_v58, %v862_v58  ;;  %v1168_v56 = vpack.c.b16 %v1161_v36, %v1160_v50  ;;  %v543_v50 = vpack.c.bf16 %v499_v49, %v498_v47  ;;  %v503_v47 = vld [vmem:[%s3404_s2 + $0x118] sm:$0xff] }
 0x125   :  { %v1165_v44 = vunpack.c.l.b16 %v922_v2  ;;  %v1181_v3 = vsel %vm75_vm0, %v1168_v56, 0 }
 0x126   :  { %v368_v6 = vpop.f32.mrf.mxu1 }
 0x127   :  { %v1170_v9 = vpack.c.b16 %v1165_v44, %v1164_v42  ;;  %v369_v13 = vadd.f32 %v2228_v28, %v368_v6  ;;  %v494_v42 = vld [vmem:[%s3404_s2 + $0xd0] sm:$0xff]  ;;  %v495_v44 = vld [vmem:[%s3404_s2 + $0xd8] sm:$0xff]  ;;  %1950 = vmatmul.msk.bf16.gmra.mxu0 %vm75_vm0, %v531_v29 }
 0x129   :  { %1927 = vmatmul.msk.bf16.gmra.mxu1 %vm75_vm0, %v187_v46  ;;  %v1187_v14 = vsel %vm75_vm0, %v1170_v9, 0  ;;  %v863_v27 = vmul.f32 %v2235_v32, %v369_v13  ;;  %v541_v46 = vpack.c.bf16 %v495_v44, %v494_v42  ;;  %v500_v44 = vld [vmem:[%s3404_s2 + $0x100] sm:$0xff] }
 0x12a   :  { %1192 = vmatpush.bf16.xpose.msra.mxu0 %v1187_v14 }
 0x12b   :  { %v923_v37 = vpack.c.bf16 %v863_v27, %v863_v27  ;;  %1960 = vmatmul.msk.bf16.gmra.mxu2 %vm75_vm0, %v541_v46  ;;  %v827_v27 = vmul.f32 0.5, %v95_v17  ;;  %v501_v46 = vld [vmem:[%s3404_s2 + $0x108] sm:$0xff] }
 0x12d   :  { %v2579_v54 = vunpack.c.l.b16 %v923_v37  ;;  %v190_v37 = vpack.c.bf16 %v152_v30, %v151_v25 }
 0x12e   :  { %v370_v31 = vpop.f32.mrf.mxu1 }
 0x12f   :  { %v371_v34 = vadd.f32 %v2228_v28, %v370_v31  ;;  %v496_v31 = vld [vmem:[%s3404_s2 + $0xe0] sm:$0xff] }
 0x130   :  { %v542_v36 = vpack.c.bf16 %v497_v33, %v496_v31 }
 0x131   :  { %v864_v38 = vmul.f32 %v2241_v35, %v371_v34  ;;  %v1083_v34 = vpack.c.bf16 %v827_v27, %v827_v27 }
 0x132   :  { %1193 = vmatpush.bf16.xpose.msra.mxu0 %v1184_v39  ;;  %v2655_v39 = vpop.f32.mrf.mxu3 }
 0x133   :  { %v924_v52 = vpack.c.bf16 %v864_v38, %v864_v38  ;;  %1977 = vmatmul.msk.bf16.vlgmr.msrb.gmra.mxu3 %vm75_vm0, %v1083_v34 }
 0x135   :  { %v2581_v58 = vunpack.c.l.b16 %v924_v52 }
 0x136   :  { %v373_v61 = vpop.f32.mrf.mxu1 }
 0x137   :  { %v1222_v63 = vpack.c.b16 %v2581_v58, %v2579_v54  ;;  %v374_v2 = vadd.f32 %v2228_v28, %v373_v61  ;;  %1951 = vmatmul.msk.bf16.gmra.mxu0 %vm75_vm0, %v532_v43  ;;  %v153_v61 = vld [vmem:[%s3403_s1 + $0x160] sm:$0xff]  ;;  %v481_v54 = vld [vmem:[%s3404_s2 + $0x68] sm:$0xff] }
 0x138   :  { %v191_v1 = vpack.c.bf16 %v154_v0, %v153_v61 }
 0x139   :  { %1928 = vmatmul.msk.bf16.gmra.mxu1 %vm75_vm0, %v188_v60  ;;  %v865_v6 = vmul.f32 %v2262_v48, %v374_v2 }
 0x13a   :  { %1194 = vmatpush.bf16.xpose.msra.mxu0 %v1181_v3  ;;  %v2672_v60 = vpop.f32.mrf.mxu3 }
 0x13b   :  { %v925_v9 = vpack.c.bf16 %v865_v6, %v865_v6  ;;  %1961 = vmatmul.msk.bf16.gmra.mxu2 %vm75_vm0, %v542_v36  ;;  %v544_v6 = vpack.c.bf16 %v501_v46, %v500_v44 }
 0x13d   :  { %v2615_v14 = vunpack.c.l.b16 %v925_v9 }
 0x13e   :  { %v375_v7 = vpop.f32.mrf.mxu1  ;;  %v2674_v56 = vpop.f32.mrf.mxu2 }
 0x13f   :  { %v376_v8 = vadd.f32 %v2228_v28, %v375_v7 }
 0x141   :  { %v866_v10 = vmul.f32 %v2268_v51, %v376_v8 }
 0x142   :  { %1195 = vmatpush.bf16.xpose.msra.mxu0 %v1178_v11 }
 0x143   :  { %v926_v13 = vpack.c.bf16 %v866_v10, %v866_v10 }
 0x145   :  { %v2617_v57 = vunpack.c.l.b16 %v926_v13 }
 0x146   :  { %v2624_v55 = vpop.f32.mrf.mxu1  ;;  %v2682_v4 = vpop.f32.mrf.mxu2 }
 0x147   :  { %v1223_v19 = vpack.c.b16 %v2617_v57, %v2615_v14  ;;  %v379_v34 = vadd.f32 %v2228_v28, %v2624_v55  ;;  %v502_v55 = vld [vmem:[%s3404_s2 + $0x110] sm:$0xff] }
 0x149   :  { %1929 = vmatmul.msk.bf16.gmra.mxu1 %vm75_vm0, %v189_v16  ;;  %v867_v49 = vmul.f32 %v2366_v53, %v379_v34 }
 0x14a   :  { %1196 = vmatpush.bf16.xpose.msra.mxu0 %v1175_v26 }
 0x14b   :  { %1962 = vmatmul.msk.bf16.gmra.mxu2 %vm75_vm0, %v543_v50 }
 0x14e   :  { %v380_v24 = vpop.f32.mrf.mxu1 }
 0x14f   :  { %v381_v26 = vadd.f32 %v2228_v28, %v380_v24 }
 0x151   :  { %v868_v40 = vmul.f32 %v2360_v45, %v381_v26 }
 0x153   :  { %v928_v61 = vpack.c.bf16 %v868_v40, %v868_v40 }
 0x154   :  { %v438_v3 = vpop.f32.mrf.mxu3 }
 0x156   :  { %v383_v38 = vpop.f32.mrf.mxu1 }
 0x157   :  { %v384_v10 = vadd.f32 %v2228_v28, %v383_v38 }
 0x159   :  { %1930 = vmatmul.msk.bf16.gmra.mxu1 %vm75_vm0, %v190_v37  ;;  %v869_v21 = vmul.f32 %v2335_v23, %v384_v10  ;;  %v2709_v37 = vpop.f32.mrf.mxu0 }
 0x15b   :  { %1963 = vmatmul.msk.bf16.gmra.mxu2 %vm75_vm0, %v544_v6  ;;  %v2699_v13 = vpop.f32.mrf.mxu2  ;;  %v929_v36 = vpack.c.bf16 %v869_v21, %v869_v21 }
 0x15c   :  { %v440_v5 = vpop.f32.mrf.mxu3 }
 0x15d   :  { %v1218_v50 = vunpack.c.l.b16 %v929_v36  ;;  %v441_v21 = vadd.f32 %v2228_v28, %v440_v5 }
 0x15e   :  { %v385_v52 = vpop.f32.mrf.mxu1 }
 0x15f   :  { %v386_v7 = vadd.f32 %v2228_v28, %v385_v52  ;;  %v545_v52 = vpack.c.bf16 %v503_v47, %v502_v55  ;;  %v892_v34 = vmul.f32 %v2328_v20, %v441_v21  ;;  %v434_v55 = vadd.f32 %v2228_v28, %v2655_v39 }
 0x161   :  { %v870_v16 = vmul.f32 %v2323_v18, %v386_v7  ;;  %v2728_v6 = vpop.f32.mrf.mxu0 }
 0x163   :  { %v930_v27 = vpack.c.bf16 %v870_v16, %v870_v16  ;;  %v2711_v38 = vpop.f32.mrf.mxu2 }
 0x164   :  { %v2707_v30 = vpop.f32.mrf.mxu3 }
 0x165   :  { %v1219_v41 = vunpack.c.l.b16 %v930_v27 }
 0x166   :  { %v388_v2 = vpop.f32.mrf.mxu1 }
 0x167   :  { %v389_v42 = vadd.f32 %v2228_v28, %v388_v2  ;;  %v1225_v0 = vpack.c.b16 %v1219_v41, %v1218_v50  ;;  %v479_v50 = vld [vmem:[%s3404_s2 + $0x58] sm:$0xff] }
 0x169   :  { %1931 = vmatmul.msk.bf16.gmra.mxu1 %vm75_vm0, %v191_v1  ;;  %v871_v8 = vmul.f32 %v2316_v15, %v389_v42  ;;  %v927_v42 = vpack.c.bf16 %v867_v49, %v867_v49  ;;  %v1240_v10 = vsel %vm75_vm0, %v1225_v0, 0  ;;  %v2748_v36 = vpop.f32.mrf.mxu0  ;;  %v478_v49 = vld [vmem:[%s3404_s2 + $0x50] sm:$0xff]  ;;  %v952_v0 = vpack.c.bf16 %v892_v34, %v892_v34 }
 0x16b   :  { %v931_v59 = vpack.c.bf16 %v871_v8, %v871_v8  ;;  %1964 = vmatmul.msk.bf16.gmra.mxu2 %vm75_vm0, %v545_v52  ;;  %v722_v7 = vpop.f32.mrf.mxu2  ;;  %v1217_v8 = vunpack.c.l.b16 %v928_v61  ;;  %v1216_v16 = vunpack.c.l.b16 %v927_v42  ;;  %v436_v52 = vadd.f32 %v2228_v28, %v2672_v60 }
 0x16c   :  { %v2726_v46 = vpop.f32.mrf.mxu3  ;;  %v1234_v60 = vsel %vm75_vm0, %v1223_v19, 0 }
 0x16d   :  { %v1220_v29 = vunpack.c.l.b16 %v931_v59  ;;  %v1224_v26 = vpack.c.b16 %v1217_v8, %v1216_v16  ;;  %v1333_v16 = vunpack.c.l.b16 %v952_v0  ;;  %v506_v0 = vld [vmem:[%s3404_s2 + $0x130] sm:$0xff] }
 0x16e   :  { %v390_v9 = vpop.f32.mrf.mxu1 }
 0x16f   :  { %v391_v11 = vadd.f32 %v2228_v28, %v390_v9  ;;  %v1237_v40 = vsel %vm75_vm0, %v1224_v26, 0 }
 0x171   :  { %v872_v17 = vmul.f32 %v2328_v20, %v391_v11 }
 0x173   :  { %v932_v22 = vpack.c.bf16 %v872_v17, %v872_v17  ;;  %v439_v17 = vadd.f32 %v2228_v28, %v438_v3 }
 0x175   :  { %v1221_v31 = vunpack.c.l.b16 %v932_v22 }
 0x176   :  { %v393_v33 = vpop.f32.mrf.mxu1 }
 0x177   :  { %v1226_v25 = vpack.c.b16 %v1221_v31, %v1220_v29  ;;  %v394_v43 = vadd.f32 %v2228_v28, %v393_v33  ;;  %v2744_v31 = vpop.f32.mrf.mxu3  ;;  %v891_v33 = vmul.f32 %v2316_v15, %v439_v17 }
 0x179   :  { %v1243_v24 = vsel %vm75_vm0, %v1226_v25, 0  ;;  %v873_v1 = vmul.f32 %v2235_v32, %v394_v43  ;;  %v2735_v32 = vld [vmem:[%s3410_s8] ss:$0 sm:$0xff]  ;;  %v724_v25 = vpop.f32.mrf.mxu2  ;;  %v505_v43 = vld [vmem:[%s3404_s2 + $0x128] sm:$0xff]  ;;  %v951_v61 = vpack.c.bf16 %v891_v33, %v891_v33 }
 0x17a   :  { %1248 = vmatpush.bf16.xpose.msra.mxu3 %v1243_v24  ;;  %v504_v24 = vld [vmem:[%s3404_s2 + $0x120] sm:$0xff]  ;;  %v725_v39 = vadd.f32 %v2735_v32, %v724_v25 }
 0x17b   :  { %v933_v11 = vpack.c.bf16 %v873_v1, %v873_v1  ;;  %v546_v47 = vpack.c.bf16 %v505_v43, %v504_v24  ;;  %v533_v1 = vpack.c.bf16 %v479_v50, %v478_v49 }
 0x17c   :  { %v982_v8 = vmul.f32 %v2328_v20, %v725_v39 }
 0x17d   :  { %v2742_v27 = vunpack.c.l.b16 %v933_v11  ;;  %1965 = vmatmul.msk.bf16.gmra.mxu2 %vm75_vm0, %v546_v47  ;;  %1952 = vmatmul.msk.bf16.gmra.mxu0 %vm75_vm0, %v533_v1  ;;  %v1332_v11 = vunpack.c.l.b16 %v951_v61  ;;  %v507_v1 = vld [vmem:[%s3404_s2 + $0x138] sm:$0xff] }
 0x17e   :  { %v395_v2 = vpop.f32.mrf.mxu1  ;;  %v1042_v57 = vpack.c.bf16 %v982_v8, %v982_v8  ;;  %v97_v8 = vadd.f32 %v2622_v62, %v2697_v12 }
 0x17f   :  { %v396_v44 = vadd.f32 %v2228_v28, %v395_v2  ;;  %v1338_v34 = vpack.c.b16 %v1333_v16, %v1332_v11 }
 0x180   :  { %v828_v11 = vmul.f32 0.5, %v97_v8 }
 0x181   :  { %v874_v9 = vmul.f32 %v2241_v35, %v396_v44  ;;  %v723_v35 = vadd.f32 %v2735_v32, %v722_v7  ;;  %v2787_v17 = vpop.f32.mrf.mxu2  ;;  %v1355_v47 = vsel %vm75_vm0, %v1338_v34, 0 }
 0x182   :  { %1249 = vmatpush.bf16.xpose.msra.mxu3 %v1240_v10  ;;  %v890_v10 = vmul.f32 %v2323_v18, %v436_v52 }
 0x183   :  { %v934_v59 = vpack.c.bf16 %v874_v9, %v874_v9  ;;  %v981_v41 = vmul.f32 %v2316_v15, %v723_v35  ;;  %v2781_v9 = vpop.f32.mrf.mxu3  ;;  %v2792_v35 = vunpack.c.l.b16 %v1042_v57  ;;  %v508_v57 = vld [vmem:[%s3404_s2 + $0x140] sm:$0xff] }
 0x184   :  { %v950_v33 = vpack.c.bf16 %v890_v10, %v890_v10 }
 0x185   :  { %v2739_v22 = vunpack.c.l.b16 %v934_v59  ;;  %v1041_v42 = vpack.c.bf16 %v981_v41, %v981_v41  ;;  %v2785_v59 = vpop.f32.mrf.mxu0 }
 0x186   :  { %v398_v29 = vpop.f32.mrf.mxu1 }
 0x187   :  { %v1278_v3 = vpack.c.b16 %v2739_v22, %v2742_v27  ;;  %v399_v5 = vadd.f32 %v2228_v28, %v398_v29  ;;  %v2790_v14 = vunpack.c.l.b16 %v1041_v42  ;;  %v480_v42 = vld [vmem:[%s3404_s2 + $0x60] sm:$0xff]  ;;  %v517_v22 = vld [vmem:[%s3404_s2 + $0x188] sm:$0xff] }
 0x189   :  { %v875_v2 = vmul.f32 %v2262_v48, %v399_v5  ;;  %v889_v48 = vmul.f32 %v2335_v23, %v434_v55  ;;  %v1331_v55 = vunpack.c.l.b16 %v950_v33  ;;  %v2809_v50 = vpop.f32.mrf.mxu2 }
 0x18a   :  { %1250 = vmatpush.bf16.xpose.msra.mxu3 %v1237_v40  ;;  %v100_v40 = vadd.f32 %v2622_v62, %v2709_v37  ;;  %v1231_v37 = vsel %vm75_vm0, %v1222_v63, 0  ;;  %v534_v63 = vpack.c.bf16 %v481_v54, %v480_v42 }
 0x18b   :  { %v935_v21 = vpack.c.bf16 %v875_v2, %v875_v2  ;;  %v949_v29 = vpack.c.bf16 %v889_v48, %v889_v48  ;;  %v2807_v49 = vpop.f32.mrf.mxu3  ;;  %v547_v2 = vpack.c.bf16 %v507_v1, %v506_v0 }
 0x18c   :  { %v829_v52 = vmul.f32 0.5, %v100_v40 }
 0x18d   :  { %v2794_v25 = vunpack.c.l.b16 %v935_v21  ;;  %v1330_v43 = vunpack.c.l.b16 %v949_v29  ;;  %v2815_v61 = vpop.f32.mrf.mxu0  ;;  %1966 = vmatmul.msk.bf16.gmra.mxu2 %vm75_vm0, %v547_v2  ;;  %1953 = vmatmul.msk.bf16.gmra.mxu0 %vm75_vm0, %v534_v63 }
 0x18e   :  { %v400_v44 = vpop.f32.mrf.mxu1  ;;  %v1085_v39 = vpack.c.bf16 %v829_v52, %v829_v52 }
 0x18f   :  { %v401_v7 = vadd.f32 %v2228_v28, %v400_v44  ;;  %v1337_v58 = vpack.c.b16 %v1331_v55, %v1330_v43  ;;  %v713_v43 = vadd.f32 %v2735_v32, %v2674_v56  ;;  %v715_v55 = vadd.f32 %v2735_v32, %v2682_v4  ;;  %v510_v56 = vld [vmem:[%s3404_s2 + $0x150] sm:$0xff]  ;;  %v511_v4 = vld [vmem:[%s3404_s2 + $0x158] sm:$0xff] }
 0x190   :  { %v549_v63 = vpack.c.bf16 %v511_v4, %v510_v56 }
 0x191   :  { %v876_v26 = vmul.f32 %v2268_v51, %v401_v7  ;;  %v1352_v7 = vsel %vm75_vm0, %v1337_v58, 0  ;;  %v978_v52 = vmul.f32 %v2360_v45, %v715_v55  ;;  %v730_v51 = vadd.f32 %v2735_v32, %v2809_v50 }
 0x192   :  { %1251 = vmatpush.bf16.xpose.msra.mxu3 %v1234_v60  ;;  %v2832_v60 = vpop.f32.mrf.mxu2 }
 0x193   :  { %v936_v19 = vpack.c.bf16 %v876_v26, %v876_v26  ;;  %v455_v48 = vpop.f32.mrf.mxu3  ;;  %v1084_v26 = vpack.c.bf16 %v828_v11, %v828_v11  ;;  %v1038_v58 = vpack.c.bf16 %v978_v52, %v978_v52  ;;  %v720_v52 = vadd.f32 %v2735_v32, %v2711_v38 }
 0x195   :  { %v2796_v5 = vunpack.c.l.b16 %v936_v19  ;;  %v2837_v10 = vpop.f32.mrf.mxu0  ;;  %v509_v19 = vld [vmem:[%s3404_s2 + $0x148] sm:$0xff]  ;;  %v2883_v11 = vunpack.c.l.b16 %v1038_v58 }
 0x196   :  { %v2802_v41 = vpop.f32.mrf.mxu1  ;;  %v548_v12 = vpack.c.bf16 %v509_v19, %v508_v57 }
 0x197   :  { %v1279_v24 = vpack.c.b16 %v2796_v5, %v2794_v25  ;;  %3424 = vst [vmem:[#allocation6_spill] sm:$0xff] %v2883_v11  ;;  %v3015_v25 = vld [vmem:[%s3413_s11] sm:$0xff] }
 0x19a   :  { %1252 = vmatpush.bf16.xpose.msra.mxu3 %v1231_v37  ;;  %v2839_v21 = vpop.f32.mrf.mxu2 }
 0x19b   :  { %v2847_v29 = vpop.f32.mrf.mxu3 }
 0x19d   :  { %v2849_v34 = vpop.f32.mrf.mxu0  ;;  %1967 = vmatmul.msk.bf16.gmra.mxu2 %vm75_vm0, %v548_v12  ;;  %1978 = vmatmul.msk.bf16.vlgmr.msra.gmra.mxu0 %vm75_vm0, %v1084_v26 }
 0x19e   :  { %v405_v44 = vpop.f32.mrf.mxu1 }
 0x1a1   :  { %1979 = vmatmul.msk.bf16.vlgmr.msra.gmra.mxu3 %vm75_vm0, %v1085_v39  ;;  %v2877_v39 = vld [vmem:[%s3408_s6] ss:$0 sm:$0xff] }
 0x1a2   :  { %1360 = vmatpush.bf16.xpose.msrb.mxu3 %v1355_v47  ;;  %v2853_v40 = vpop.f32.mrf.mxu2  ;;  %v977_v47 = vmul.f32 %v2366_v53, %v713_v43  ;;  %v718_v43 = vadd.f32 %v2735_v32, %v2699_v13 }
 0x1a3   :  { %v2861_v0 = vpop.f32.mrf.mxu3 }
 0x1a4   :  { %v1037_v54 = vpack.c.bf16 %v977_v47, %v977_v47  ;;  %v979_v38 = vmul.f32 %v2335_v23, %v718_v43 }
 0x1a5   :  { %v2863_v1 = vpop.f32.mrf.mxu0 }
 0x1a6   :  { %v408_v16 = vpop.f32.mrf.mxu1  ;;  %v2881_v8 = vunpack.c.l.b16 %v1037_v54 }
 0x1a7   :  { %v409_v57 = vadd.f32 %v2877_v39, %v408_v16  ;;  %v456_v16 = vadd.f32 %v2877_v39, %v455_v48 }
 0x1a8   :  { %3423 = vst [vmem:[#allocation5_spill] sm:$0xff] %v2881_v8 }
 0x1a9   :  { %v879_v54 = vmul.f32 %v2335_v23, %v409_v57  ;;  %v898_v48 = vmul.f32 %v2360_v45, %v456_v16  ;;  %v1039_v23 = vpack.c.bf16 %v979_v38, %v979_v38 }
 0x1aa   :  { %1361 = vmatpush.bf16.xpose.msrb.mxu3 %v1352_v7  ;;  %v2866_v42 = vpop.f32.mrf.mxu2 }
 0x1ab   :  { %v463_v12 = vpop.f32.mrf.mxu3  ;;  %v939_v57 = vpack.c.bf16 %v879_v54, %v879_v54 }
 0x1ad   :  { %1968 = vmatmul.msk.bf16.gmra.mxu2 %vm75_vm0, %v549_v63 }
 0x1ae   :  { %v410_v33 = vpop.f32.mrf.mxu1 }
 0x1b2   :  { %v2892_v47 = vpop.f32.mrf.mxu2 }
 0x1b6   :  { %v413_v37 = vpop.f32.mrf.mxu1 }
 0x1b7   :  { %v414_v2 = vadd.f32 %v2228_v28, %v413_v37  ;;  %v411_v28 = vadd.f32 %v2877_v39, %v410_v33  ;;  %v454_v37 = vadd.f32 %v2877_v39, %v2807_v49 }
 0x1b9   :  { %v881_v7 = vmul.f32 %v2316_v15, %v414_v2  ;;  %v880_v55 = vmul.f32 %v2323_v18, %v411_v28  ;;  %v2899_v2 = vpop.f32.mrf.mxu0  ;;  %v980_v28 = vmul.f32 %v2323_v18, %v720_v52  ;;  %v897_v49 = vmul.f32 %v2366_v53, %v454_v37  ;;  %v465_v37 = vpop.f32.mrf.mxu3 }
 0x1ba   :  { %v958_v52 = vpack.c.bf16 %v898_v48, %v898_v48 }
 0x1bb   :  { %v941_v33 = vpack.c.bf16 %v881_v7, %v881_v7  ;;  %v940_v56 = vpack.c.bf16 %v880_v55, %v880_v55  ;;  %v1040_v18 = vpack.c.bf16 %v980_v28, %v980_v28  ;;  %v957_v43 = vpack.c.bf16 %v897_v49, %v897_v49 }
 0x1bd   :  { %v1276_v4 = vunpack.c.l.b16 %v941_v33  ;;  %v1275_v55 = vunpack.c.l.b16 %v940_v56  ;;  %v2928_v38 = vunpack.c.l.b16 %v1040_v18  ;;  %v2930_v28 = vunpack.c.l.b16 %v957_v43 }
 0x1be   :  { %v415_v26 = vpop.f32.mrf.mxu1 }
 0x1bf   :  { %v416_v19 = vadd.f32 %v2877_v39, %v415_v26  ;;  %v404_v26 = vadd.f32 %v2877_v39, %v2802_v41  ;;  %v512_v41 = vld [vmem:[%s3404_s2 + $0x160] sm:$0xff] }
 0x1c1   :  { %v882_v15 = vmul.f32 %v2328_v20, %v416_v19  ;;  %v406_v20 = vadd.f32 %v2877_v39, %v405_v44  ;;  %v877_v16 = vmul.f32 %v2366_v53, %v404_v26  ;;  %v2924_v54 = vpop.f32.mrf.mxu0  ;;  %v2932_v53 = vunpack.c.l.b16 %v958_v52 }
 0x1c2   :  { %v464_v52 = vadd.f32 %v2877_v39, %v463_v12  ;;  %v2969_v12 = vld [vmem:[%s3413_s11 + $0x48] sm:$0xff] }
 0x1c3   :  { %v942_v58 = vpack.c.bf16 %v882_v15, %v882_v15  ;;  %v878_v44 = vmul.f32 %v2360_v45, %v406_v20  ;;  %v2915_v15 = vpop.f32.mrf.mxu2  ;;  %v513_v45 = vld [vmem:[%s3404_s2 + $0x168] sm:$0xff]  ;;  %v937_v48 = vpack.c.bf16 %v877_v16, %v877_v16  ;;  %v466_v16 = vadd.f32 %v2877_v39, %v465_v37 }
 0x1c4   :  { %v550_v20 = vpack.c.bf16 %v513_v45, %v512_v41 }
 0x1c5   :  { %v1277_v63 = vunpack.c.l.b16 %v942_v58  ;;  %v1274_v58 = vunpack.c.l.b16 %v939_v57  ;;  %v938_v56 = vpack.c.bf16 %v878_v44, %v878_v44  ;;  %v2943_v44 = vld [vmem:[%s3414_s12] sm:$0xff]  ;;  %v1272_v18 = vunpack.c.l.b16 %v937_v48 }
 0x1c6   :  { %v2909_v7 = vpop.f32.mrf.mxu1  ;;  %1969 = vmatmul.msk.bf16.gmra.mxu2 %vm75_vm0, %v550_v20  ;;  %3425 = vst [vmem:[#allocation7_spill] sm:$0xff] %v2943_v44  ;;  %v902_v37 = vmul.f32 %v2969_v12, %v466_v16  ;;  %v461_v16 = vadd.f32 %v2877_v39, %v2861_v0 }
 0x1c7   :  { %v1282_v19 = vpack.c.b16 %v1277_v63, %v1276_v4  ;;  %v1281_v4 = vpack.c.b16 %v1275_v55, %v1274_v58  ;;  %v2926_v63 = vunpack.c.l.b16 %v1039_v23  ;;  %v1273_v26 = vunpack.c.l.b16 %v938_v56  ;;  %v1142_v55 = vpop.f32.mrf.mxu3  ;;  %v2963_v56 = vld [vmem:[%s3413_s11 + $0x40] sm:$0xff] }
 0x1c8   :  { %v2950_v43 = vadd.f32 %v1142_v55, %v2943_v44  ;;  %v459_v55 = vadd.f32 %v2877_v39, %v2847_v29  ;;  %v2989_v29 = vld [vmem:[%s3413_s11 + $0x30] sm:$0xff] }
 0x1c9   :  { %v1299_v33 = vsel %vm75_vm0, %v1282_v19, 0  ;;  %v1296_v57 = vsel %vm75_vm0, %v1281_v4, 0  ;;  %v1280_v58 = vpack.c.b16 %v1273_v26, %v1272_v18  ;;  %v2958_v20 = vpop.f32.mrf.mxu0  ;;  %v901_v4 = vmul.f32 %v2963_v56, %v464_v52  ;;  %v514_v18 = vld [vmem:[%s3404_s2 + $0x170] sm:$0xff]  ;;  %v515_v52 = vld [vmem:[%s3404_s2 + $0x178] sm:$0xff] }
 0x1ca   :  { %1304 = vmatpush.bf16.xpose.msrb.mxu0 %v1299_v33  ;;  %3426 = vst [vmem:[#allocation8_spill] sm:$0xff] %v2950_v43  ;;  %v1427_v41 = vsel %vm1426_vm1, %v2950_v43, -inf  ;;  %v551_v13 = vpack.c.bf16 %v515_v52, %v514_v18 }
 0x1cb   :  { %v2938_v19 = vpop.f32.mrf.mxu2  ;;  %1428 = vmax.xlane.f32.xlu0 %v1427_v41  ;;  %v1293_v48 = vsel %vm75_vm0, %v1280_v58, 0  ;;  %v961_v41 = vpack.c.bf16 %v901_v4, %v901_v4  ;;  %v962_v58 = vpack.c.bf16 %v902_v37, %v902_v37 }
 0x1cd   :  { %v1388_v4 = vunpack.c.l.b16 %v961_v41  ;;  %v1389_v37 = vunpack.c.l.b16 %v962_v58  ;;  %v102_v58 = vadd.f32 %v2622_v62, %v2728_v6 }
 0x1ce   :  { %v2934_v49 = vpop.f32.mrf.mxu1 }
 0x1cf   :  { %v1394_v41 = vpack.c.b16 %v1389_v37, %v1388_v4  ;;  %v830_v6 = vmul.f32 0.5, %v102_v58 }
 0x1d1   :  { %v2998_v18 = vpop.f32.mrf.mxu0  ;;  %v1411_v4 = vsel %vm75_vm0, %v1394_v41, 0  ;;  %v1086_v41 = vpack.c.bf16 %v830_v6, %v830_v6  ;;  %v733_v6 = vadd.f32 %v2735_v32, %v2832_v60 }
 0x1d2   :  { %1305 = vmatpush.bf16.xpose.msrb.mxu0 %v1296_v57  ;;  %v1144_v57 = vpop.f32.mrf.mxu3 }
 0x1d3   :  { %v2973_v26 = vpop.f32.mrf.mxu2  ;;  %v2995_v57 = vld [vmem:[%s3413_s11 + $0x38] sm:$0xff] }
 0x1d4   :  { %v900_v0 = vmul.f32 %v2995_v57, %v461_v16 }
 0x1d6   :  { %v2956_v45 = vpop.f32.mrf.mxu1  ;;  %1970 = vmatmul.msk.bf16.gmra.mxu2 %vm75_vm0, %v551_v13  ;;  %v1290_v13 = vsel %vm75_vm0, %v1279_v24, 0  ;;  %v960_v16 = vpack.c.bf16 %v900_v0, %v900_v0 }
 0x1d8   :  { %v1387_v0 = vunpack.c.l.b16 %v960_v16  ;;  %v516_v16 = vld [vmem:[%s3404_s2 + $0x180] sm:$0xff] }
 0x1d9   :  { %v697_v44 = vpop.f32.mrf.mxu0 }
 0x1da   :  { %1306 = vmatpush.bf16.xpose.msrb.mxu0 %v1293_v48  ;;  %v899_v48 = vmul.f32 %v2989_v29, %v459_v55  ;;  %v728_v55 = vadd.f32 %v2735_v32, %v2787_v17  ;;  %v3021_v17 = vld [vmem:[%s3413_s11 + $0x8] sm:$0xff] }
 0x1db   :  { %v3004_v52 = vpop.f32.mrf.mxu2  ;;  %v984_v24 = vmul.f32 %v3021_v17, %v730_v51  ;;  %v449_v51 = vadd.f32 %v2877_v39, %v2744_v31  ;;  %v3046_v31 = vld [vmem:[%s3413_s11 + $0x20] sm:$0xff] }
 0x1dc   :  { %3427 = vst [vmem:[#allocation9_spill] sm:$0xff] %v3004_v52  ;;  %v959_v33 = vpack.c.bf16 %v899_v48, %v899_v48  ;;  %v983_v5 = vmul.f32 %v3015_v25, %v728_v55 }
 0x1dd   :  { %v1044_v52 = vpack.c.bf16 %v984_v24, %v984_v24 }
 0x1de   :  { %v425_v23 = vpop.f32.mrf.mxu1  ;;  %v1386_v48 = vunpack.c.l.b16 %v959_v33  ;;  %v1043_v43 = vpack.c.bf16 %v983_v5, %v983_v5  ;;  %v451_v33 = vadd.f32 %v2877_v39, %v2781_v9 }
 0x1df   :  { %v426_v58 = vadd.f32 %v2877_v39, %v425_v23  ;;  %v3051_v24 = vunpack.c.l.b16 %v1044_v52  ;;  %v424_v52 = vadd.f32 %v2877_v39, %v2956_v45  ;;  %v3080_v45 = vld [vmem:[%s3413_s11 + $0x28] sm:$0xff] }
 0x1e0   :  { %v1393_v27 = vpack.c.b16 %v1387_v0, %v1386_v48  ;;  %v3049_v5 = vunpack.c.l.b16 %v1043_v43  ;;  %v3057_v48 = vld [vmem:[%s3413_s11 + $0x10] sm:$0xff]  ;;  %v3063_v0 = vld [vmem:[%s3413_s11 + $0x18] sm:$0xff] }
 0x1e1   :  { %3430 = vst [vmem:[#allocation12_spill] sm:$0xff] %v3051_v24  ;;  %v895_v23 = vmul.f32 %v3057_v48, %v449_v51  ;;  %v896_v43 = vmul.f32 %v3063_v0, %v451_v33 }
 0x1e2   :  { %1307 = vmatpush.bf16.xpose.msrb.mxu0 %v1290_v13  ;;  %v1287_v13 = vsel %vm75_vm0, %v1278_v3, 0  ;;  %v552_v3 = vpack.c.bf16 %v517_v22, %v516_v16  ;;  %3429 = vst [vmem:[#allocation11_spill] sm:$0xff] %v3049_v5  ;;  %v1408_v51 = vsel %vm75_vm0, %v1393_v27, 0  ;;  %v886_v16 = vmul.f32 %v3063_v0, %v426_v58 }
 0x1e3   :  { %v3030_v55 = vpop.f32.mrf.mxu2  ;;  %v740_v27 = vadd.f32 %v2735_v32, %v2866_v42  ;;  %v955_v58 = vpack.c.bf16 %v895_v23, %v895_v23 }
 0x1e4   :  { %3428 = vst [vmem:[#allocation10_spill] sm:$0xff] %v3030_v55  ;;  %v946_v42 = vpack.c.bf16 %v886_v16, %v886_v16 }
 0x1e6   :  { %v428_v50 = vpop.f32.mrf.mxu1  ;;  %1971 = vmatmul.msk.bf16.gmra.mxu2 %vm75_vm0, %v552_v3  ;;  %v1382_v3 = vunpack.c.l.b16 %v955_v58  ;;  %v1327_v5 = vunpack.c.l.b16 %v946_v42 }
 0x1e7   :  { %v429_v37 = vadd.f32 %v2877_v39, %v428_v50 }
 0x1e9   :  { %v887_v9 = vmul.f32 %v3046_v31, %v429_v37  ;;  %v735_v37 = vadd.f32 %v2735_v32, %v2839_v21  ;;  %v444_v21 = vadd.f32 %v2877_v39, %v2707_v30 }
 0x1ea   :  { %1308 = vmatpush.bf16.xpose.msrb.mxu0 %v1287_v13  ;;  %v738_v13 = vadd.f32 %v2735_v32, %v2853_v40  ;;  %v446_v40 = vadd.f32 %v2877_v39, %v2726_v46  ;;  %v421_v46 = vadd.f32 %v2877_v39, %v2934_v49 }
 0x1eb   :  { %v947_v22 = vpack.c.bf16 %v887_v9, %v887_v9  ;;  %v3084_v60 = vpop.f32.mrf.mxu2  ;;  %v885_v9 = vmul.f32 %v3057_v48, %v424_v52  ;;  %v986_v55 = vmul.f32 %v3063_v0, %v735_v37  ;;  %v893_v23 = vmul.f32 %v3015_v25, %v444_v21 }
 0x1ec   :  { %3431 = vst [vmem:[#allocation13_spill] sm:$0xff] %v3084_v60  ;;  %v987_v30 = vmul.f32 %v3046_v31, %v738_v13  ;;  %v699_v60 = vpop.f32.mrf.mxu0  ;;  %v894_v52 = vmul.f32 %v3021_v17, %v446_v40  ;;  %v698_v37 = vadd.f32 %v2735_v32, %v697_v44 }
 0x1ed   :  { %v1328_v8 = vunpack.c.l.b16 %v947_v22  ;;  %v1046_v22 = vpack.c.bf16 %v986_v55, %v986_v55 }
 0x1ee   :  { %v430_v50 = vpop.f32.mrf.mxu1  ;;  %v1047_v21 = vpack.c.bf16 %v987_v30, %v987_v30 }
 0x1f1   :  { %1980 = vmatmul.msk.bf16.vlgmr.msrb.gmra.mxu0 %vm75_vm0, %v1086_v41  ;;  %v956_v41 = vpack.c.bf16 %v896_v43, %v896_v43  ;;  %v419_v43 = vadd.f32 %v2877_v39, %v2909_v7 }
 0x1f2   :  { %1416 = vmatpush.bf16.xpose.msra.mxu0 %v1411_v4  ;;  %v431_v4 = vadd.f32 %v2877_v39, %v430_v50 }
 0x1f3   :  { %v1383_v49 = vunpack.c.l.b16 %v956_v41  ;;  %v3109_v24 = vpop.f32.mrf.mxu2  ;;  %v883_v39 = vmul.f32 %v3015_v25, %v419_v43  ;;  %v954_v41 = vpack.c.bf16 %v894_v52, %v894_v52  ;;  %v3128_v43 = vunpack.c.l.b16 %v1047_v21 }
 0x1f4   :  { %v888_v33 = vmul.f32 %v3080_v45, %v431_v4  ;;  %v985_v4 = vmul.f32 %v3057_v48, %v733_v6  ;;  %v988_v6 = vmul.f32 %v3080_v45, %v740_v27  ;;  %v971_v27 = vmul.f32 %v2963_v56, %v698_v37 }
 0x1f5   :  { %v943_v42 = vpack.c.bf16 %v883_v39, %v883_v39 }
 0x1f6   :  { %v948_v50 = vpack.c.bf16 %v888_v33, %v888_v33  ;;  %v700_v33 = vadd.f32 %v2735_v32, %v699_v60  ;;  %v1045_v16 = vpack.c.bf16 %v985_v4, %v985_v4  ;;  %v1048_v7 = vpack.c.bf16 %v988_v6, %v988_v6 }
 0x1f7   :  { %v695_v60 = vadd.f32 %v2735_v32, %v2998_v18  ;;  %v690_v18 = vadd.f32 %v2735_v32, %v2924_v54 }
 0x1f8   :  { %v1329_v11 = vunpack.c.l.b16 %v948_v50  ;;  %v884_v50 = vmul.f32 %v3021_v17, %v421_v46  ;;  %v972_v58 = vmul.f32 %v2969_v12, %v700_v33  ;;  %v3122_v4 = vunpack.c.l.b16 %v1045_v16 }
 0x1f9   :  { %v1391_v46 = vpack.c.b16 %v1383_v49, %v1382_v3  ;;  %v970_v52 = vmul.f32 %v2995_v57, %v695_v60  ;;  %v1381_v33 = vunpack.c.l.b16 %v954_v41  ;;  %v968_v21 = vmul.f32 %v3080_v45, %v690_v18 }
 0x1fa   :  { %1417 = vmatpush.bf16.xpose.msra.mxu0 %v1408_v51  ;;  %v945_v51 = vpack.c.bf16 %v885_v9, %v885_v9  ;;  %v1336_v13 = vpack.c.b16 %v1329_v11, %v1328_v8  ;;  %v693_v8 = vadd.f32 %v2735_v32, %v2958_v20  ;;  %v3432_v11 = vpack.c.b16 %v2932_v53, %v2930_v28 }
 0x1fb   :  { %v953_v9 = vpack.c.bf16 %v893_v23, %v893_v23  ;;  %v3124_v20 = vunpack.c.l.b16 %v1046_v22  ;;  %v944_v30 = vpack.c.bf16 %v884_v50, %v884_v50  ;;  %v688_v28 = vadd.f32 %v2735_v32, %v2899_v2  ;;  %v3143_v22 = vpop.f32.mrf.mxu2 }
 0x1fc   :  { %v1349_v40 = vsel %vm75_vm0, %v1336_v13, 0  ;;  %v1405_v44 = vsel %vm75_vm0, %v3432_v11, 0  ;;  %v1326_v55 = vunpack.c.l.b16 %v945_v51  ;;  %v969_v6 = vmul.f32 %v2989_v29, %v693_v8 }
 0x1fd   :  { %1362 = vmatpush.bf16.xpose.msrb.mxu3 %v1349_v40  ;;  %v3133_v23 = vunpack.c.l.b16 %v1048_v7  ;;  %v1031_v51 = vpack.c.bf16 %v971_v27, %v971_v27  ;;  %v1032_v37 = vpack.c.bf16 %v972_v58, %v972_v58  ;;  %v1380_v13 = vunpack.c.l.b16 %v953_v9 }
 0x1fe   :  { %v1335_v53 = vpack.c.b16 %v1327_v5, %v1326_v55  ;;  %v683_v2 = vadd.f32 %v2735_v32, %v2849_v34  ;;  %v685_v5 = vadd.f32 %v2735_v32, %v2863_v1  ;;  %v1325_v3 = vunpack.c.l.b16 %v944_v30 }
 0x1ff   :  { %v967_v49 = vmul.f32 %v3046_v31, %v688_v28  ;;  %v1402_v16 = vsel %vm75_vm0, %v1391_v46, 0  ;;  %v1324_v50 = vunpack.c.l.b16 %v943_v42  ;;  %v1029_v40 = vpack.c.bf16 %v969_v6, %v969_v6 }
 0x200   :  { %v1346_v54 = vsel %vm75_vm0, %v1335_v53, 0  ;;  %v1582_v34 = vpack.c.b16 %v3124_v20, %v3122_v4  ;;  %v1030_v39 = vpack.c.bf16 %v970_v52, %v970_v52  ;;  %v1487_v7 = vunpack.c.l.b16 %v1031_v51 }
 0x201   :  { %v1488_v1 = vunpack.c.l.b16 %v1032_v37  ;;  %v1583_v8 = vpack.c.b16 %v3133_v23, %v3128_v43  ;;  %v105_v11 = vadd.f32 %v2622_v62, %v2748_v36  ;;  %v678_v55 = vadd.f32 %v2735_v32, %v2815_v61 }
 0x202   :  { %1418 = vmatpush.bf16.xpose.msra.mxu0 %v1405_v44  ;;  %v107_v44 = vadd.f32 %v2622_v62, %v2785_v59  ;;  %v680_v60 = vadd.f32 %v2735_v32, %v2837_v10  ;;  %v1334_v27 = vpack.c.b16 %v1325_v3, %v1324_v50  ;;  %v965_v58 = vmul.f32 %v3057_v48, %v683_v2  ;;  %v702_v2 = vpop.f32.mrf.mxu0 }
 0x203   :  { %v966_v9 = vmul.f32 %v3063_v0, %v685_v5  ;;  %v1027_v41 = vpack.c.bf16 %v967_v49, %v967_v49  ;;  %v1390_v30 = vpack.c.b16 %v1381_v33, %v1380_v13  ;;  %v1028_v28 = vpack.c.bf16 %v968_v21, %v968_v21  ;;  %v3165_v18 = vpop.f32.mrf.mxu2 }
 0x204   :  { %v1485_v53 = vunpack.c.l.b16 %v1029_v40  ;;  %v1486_v46 = vunpack.c.l.b16 %v1030_v39  ;;  %v1493_v36 = vpack.c.b16 %v1488_v1, %v1487_v7  ;;  %v748_v62 = vadd.f32 %v2735_v32, %v2938_v19 }
 0x205   :  { %1363 = vmatpush.bf16.xpose.msrb.mxu3 %v1346_v54  ;;  %v750_v59 = vadd.f32 %v2735_v32, %v2973_v26  ;;  %v831_v61 = vmul.f32 0.5, %v105_v11  ;;  %v832_v42 = vmul.f32 0.5, %v107_v44  ;;  %v1343_v10 = vsel %vm75_vm0, %v1334_v27, 0  ;;  %v519_v27 = vld [vmem:[%s3404_s2 + $0x198] sm:$0xff] }
 0x206   :  { %v963_v6 = vmul.f32 %v3015_v25, %v678_v55  ;;  %v964_v52 = vmul.f32 %v3021_v17, %v680_v60  ;;  %v1025_v51 = vpack.c.bf16 %v965_v58, %v965_v58  ;;  %v1399_v37 = vsel %vm75_vm0, %v1390_v30, 0 }
 0x207   :  { %v1026_v13 = vpack.c.bf16 %v966_v9, %v966_v9  ;;  %v1483_v33 = vunpack.c.l.b16 %v1027_v41  ;;  %v1484_v19 = vunpack.c.l.b16 %v1028_v28  ;;  %v1492_v26 = vpack.c.b16 %v1486_v46, %v1485_v53 }
 0x208   :  { %v743_v5 = vadd.f32 %v2735_v32, %v2892_v47  ;;  %v745_v3 = vadd.f32 %v2735_v32, %v2915_v15  ;;  %v991_v49 = vmul.f32 %v2963_v56, %v748_v62  ;;  %v992_v54 = vmul.f32 %v2969_v12, %v750_v59  ;;  %v3436_v62 = vld [vmem:[#allocation5_spill] sm:$0xff] }
 0x209   :  { %v1087_v50 = vpack.c.bf16 %v831_v61, %v831_v61  ;;  %v1088_v21 = vpack.c.bf16 %v832_v42, %v832_v42  ;;  %v1023_v40 = vpack.c.bf16 %v963_v6, %v963_v6  ;;  %v1024_v39 = vpack.c.bf16 %v964_v52, %v964_v52 }
 0x20a   :  { %1419 = vmatpush.bf16.xpose.msra.mxu0 %v1402_v16  ;;  %v3433_v16 = vpack.c.b16 %v2792_v35, %v2790_v14  ;;  %v1481_v7 = vunpack.c.l.b16 %v1025_v51  ;;  %v1482_v1 = vunpack.c.l.b16 %v1026_v13  ;;  %v1491_v11 = vpack.c.b16 %v1484_v19, %v1483_v33  ;;  %v518_v35 = vld [vmem:[%s3404_s2 + $0x190] sm:$0xff]  ;;  %v704_v30 = vpop.f32.mrf.mxu0 }
 0x20b   :  { %v989_v47 = vmul.f32 %v2989_v29, %v743_v5  ;;  %v990_v15 = vmul.f32 %v2995_v57, %v745_v3  ;;  %v1051_v44 = vpack.c.bf16 %v991_v49, %v991_v49  ;;  %v1052_v55 = vpack.c.bf16 %v992_v54, %v992_v54  ;;  %v767_v14 = vpop.f32.mrf.mxu2  ;;  %v520_v5 = vld [vmem:[%s3404_s2 + $0x1a0] sm:$0xff]  ;;  %v521_v3 = vld [vmem:[%s3404_s2 + $0x1a8] sm:$0xff] }
 0x20c   :  { %v3434_v60 = vpack.c.b16 %v2928_v38, %v2926_v63  ;;  %v1479_v58 = vunpack.c.l.b16 %v1023_v40  ;;  %v1480_v9 = vunpack.c.l.b16 %v1024_v39  ;;  %v1490_v41 = vpack.c.b16 %v1482_v1, %v1481_v7 }
 0x20d   :  { %1364 = vmatpush.bf16.xpose.msrb.mxu3 %v1343_v10  ;;  %v553_v63 = vpack.c.bf16 %v519_v27, %v518_v35  ;;  %v1049_v38 = vpack.c.bf16 %v989_v47, %v989_v47  ;;  %v1050_v28 = vpack.c.bf16 %v990_v15, %v990_v15  ;;  %v1579_v53 = vunpack.c.l.b16 %v1051_v44  ;;  %v3438_v47 = vld [vmem:[#allocation7_spill] sm:$0xff] }
 0x20e   :  { %v1580_v46 = vunpack.c.l.b16 %v1052_v55  ;;  %v1489_v61 = vpack.c.b16 %v1480_v9, %v1479_v58  ;;  %v703_v33 = vadd.f32 %v2735_v32, %v702_v2  ;;  %v705_v19 = vadd.f32 %v2735_v32, %v704_v30 }
 0x20f   :  { %1972 = vmatmul.msk.bf16.gmra.mxu2 %vm75_vm0, %v553_v63  ;;  %v1577_v42 = vunpack.c.l.b16 %v1049_v38  ;;  %v1578_v10 = vunpack.c.l.b16 %v1050_v28  ;;  %v768_v39 = vadd.f32 %v2735_v32, %v767_v14  ;;  %v763_v43 = vadd.f32 %v2735_v32, %v3143_v22  ;;  %v3439_v28 = vld [vmem:[#allocation13_spill] sm:$0xff] }
 0x210   :  { %v1585_v6 = vpack.c.b16 %v1580_v46, %v1579_v53  ;;  %v973_v49 = vmul.f32 %v3015_v25, %v703_v33  ;;  %v765_v23 = vadd.f32 %v2735_v32, %v3165_v18  ;;  %v758_v53 = vadd.f32 %v2735_v32, %v3439_v28 }
 0x211   :  { %v999_v14 = vmul.f32 %v2989_v29, %v768_v39  ;;  %v760_v4 = vadd.f32 %v2735_v32, %v3109_v24  ;;  %v997_v20 = vmul.f32 %v3046_v31, %v763_v43 }
 0x212   :  { %1420 = vmatpush.bf16.xpose.msra.mxu0 %v1399_v37  ;;  %v707_v51 = vpop.f32.mrf.mxu0  ;;  %v1584_v37 = vpack.c.b16 %v1578_v10, %v1577_v42  ;;  %v1033_v44 = vpack.c.bf16 %v973_v49, %v973_v49 }
 0x213   :  { %v769_v52 = vpop.f32.mrf.mxu2  ;;  %v708_v13 = vadd.f32 %v2735_v32, %v707_v51  ;;  %v3443_v51 = vld [vmem:[#allocation9_spill] sm:$0xff]  ;;  %v1057_v49 = vpack.c.bf16 %v997_v20, %v997_v20 }
 0x214   :  { %1981 = vmatmul.msk.bf16.vlgmr.msrb.gmra.mxu3 %vm75_vm0, %v1087_v50  ;;  %v974_v50 = vmul.f32 %v3021_v17, %v705_v19  ;;  %v770_v7 = vadd.f32 %v2735_v32, %v769_v52  ;;  %v3444_v19 = vld [vmem:[#allocation10_spill] sm:$0xff] }
 0x215   :  { %1505 = vmatpush.bf16.msra.mxu3 %v1493_v36  ;;  %v3435_v36 = vld [vmem:[#allocation6_spill] sm:$0xff] }
 0x216   :  { %v3437_v59 = vpack.c.b16 %v3435_v36, %v3436_v62  ;;  %v1034_v55 = vpack.c.bf16 %v974_v50, %v974_v50  ;;  %v1000_v27 = vmul.f32 %v2995_v57, %v770_v7  ;;  %v3440_v36 = vld [vmem:[#allocation12_spill] sm:$0xff]  ;;  %v3441_v62 = vld [vmem:[#allocation11_spill] sm:$0xff] }
 0x218   :  { %v1526_v22 = vunpack.c.l.b16 %v1034_v55  ;;  %v1060_v42 = vpack.c.bf16 %v1000_v27, %v1000_v27 }
 0x219   :  { %1506 = vmatpush.bf16.msra.mxu3 %v1492_v26  ;;  %1982 = vmatmul.msk.bf16.vlgmr.msra.gmra.mxu0 %vm75_vm0, %v1088_v21  ;;  %v975_v26 = vmul.f32 %v3057_v48, %v708_v13 }
 0x21a   :  { %1551 = vmatpush.bf16.msrb.mxu0 %v3433_v16  ;;  %v554_v16 = vpack.c.bf16 %v521_v3, %v520_v5  ;;  %v709_v21 = vpop.f32.mrf.mxu0  ;;  %v995_v5 = vmul.f32 %v3057_v48, %v758_v53  ;;  %v996_v3 = vmul.f32 %v3063_v0, %v760_v4  ;;  %v1624_v50 = vunpack.c.l.b16 %v1060_v42  ;;  %v3445_v4 = vld [vmem:[#allocation8_spill] sm:$0xff] }
 0x21b   :  { %v772_v54 = vpop.f32.mrf.mxu2  ;;  %v1035_v1 = vpack.c.bf16 %v975_v26, %v975_v26  ;;  %v755_v26 = vadd.f32 %v2735_v32, %v3444_v19 }
 0x21c   :  { %v773_v2 = vadd.f32 %v2735_v32, %v772_v54 }
 0x21d   :  { %1507 = vmatpush.bf16.msra.mxu3 %v1491_v11  ;;  %v710_v11 = vadd.f32 %v2735_v32, %v709_v21  ;;  %v1527_v58 = vunpack.c.l.b16 %v1035_v1  ;;  %v994_v7 = vmul.f32 %v3021_v17, %v755_v26  ;;  %v1055_v1 = vpack.c.bf16 %v995_v5, %v995_v5 }
 0x21e   :  { %1552 = vmatpush.bf16.msrb.mxu0 %v3434_v60  ;;  %v1001_v60 = vmul.f32 %v2963_v56, %v773_v2 }
 0x21f   :  { %1973 = vmatmul.msk.bf16.gmra.mxu2 %vm75_vm0, %v554_v16  ;;  %v976_v35 = vmul.f32 %v3063_v0, %v710_v11  ;;  %v1054_v43 = vpack.c.bf16 %v994_v7, %v994_v7 }
 0x220   :  { %v1061_v63 = vpack.c.bf16 %v1001_v60, %v1001_v60 }
 0x221   :  { %1508 = vmatpush.bf16.msra.mxu3 %v1490_v41  ;;  %v1036_v9 = vpack.c.bf16 %v976_v35, %v976_v35  ;;  %v1525_v41 = vunpack.c.l.b16 %v1033_v44  ;;  %v1056_v44 = vpack.c.bf16 %v996_v3, %v996_v3  ;;  %v3287_v3 = vld [vmem:[%s3410_s8] ss:$0 sm:$0xff] }
 0x222   :  { %1553 = vmatpush.bf16.msrb.mxu0 %v3437_v59  ;;  %v3239_v46 = vpop.f32.mrf.mxu0  ;;  %v3442_v59 = vpack.c.b16 %v3440_v36, %v3441_v62  ;;  %v1625_v24 = vunpack.c.l.b16 %v1061_v63  ;;  %v524_v62 = vld [vmem:[%s3404_s2 + $0x1c0] sm:$0xff] }
 0x223   :  { %v774_v30 = vpop.f32.mrf.mxu2  ;;  %v1528_v38 = vunpack.c.l.b16 %v1036_v9  ;;  %v1535_v33 = vpack.c.b16 %v1526_v22, %v1525_v41  ;;  %v1620_v27 = vunpack.c.l.b16 %v1056_v44  ;;  %v1618_v22 = vunpack.c.l.b16 %v1054_v43 }
 0x224   :  { %v1254_v40 = vpop.f32.mrf.mxu3  ;;  %v775_v18 = vadd.f32 %v2735_v32, %v774_v30 }
 0x225   :  { %1509 = vmatpush.bf16.msra.mxu3 %v1489_v61  ;;  %v3216_v15 = vadd.f32 %v1254_v40, %v3438_v47  ;;  %v1059_v61 = vpack.c.bf16 %v999_v14, %v999_v14  ;;  %v1619_v14 = vunpack.c.l.b16 %v1055_v1 }
 0x226   :  { %v1002_v10 = vmul.f32 %v2969_v12, %v775_v18 }
 0x227   :  { %v1623_v16 = vunpack.c.l.b16 %v1059_v61  ;;  %v1628_v63 = vpack.c.b16 %v1620_v27, %v1619_v14 }
 0x228   :  { %v1062_v13 = vpack.c.bf16 %v1002_v10, %v1002_v10 }
 0x229   :  { %1597 = vmatpush.bf16.msrb.mxu3 %v1585_v6  ;;  %v1536_v6 = vpack.c.b16 %v1528_v38, %v1527_v58  ;;  %v1630_v60 = vpack.c.b16 %v1624_v50, %v1623_v16 }
 0x22a   :  { %v1626_v2 = vunpack.c.l.b16 %v1062_v13  ;;  %v1200_v11 = vpop.f32.mrf.mxu0 }
 0x22b   :  { %1554 = vmatpush.bf16.msrb.mxu0 %v1536_v6  ;;  %v777_v21 = vpop.f32.mrf.mxu2 }
 0x22c   :  { %v1256_v52 = vpop.f32.mrf.mxu3  ;;  %v1631_v40 = vpack.c.b16 %v1626_v2, %v1625_v24 }
 0x22d   :  { %1598 = vmatpush.bf16.msrb.mxu3 %v1584_v37  ;;  %v753_v37 = vadd.f32 %v2735_v32, %v3443_v51  ;;  %v1621_v32 = vunpack.c.l.b16 %v1057_v49  ;;  %v526_v52 = vld [vmem:[%s3404_s2 + $0x1d0] sm:$0xff]  ;;  %v527_v51 = vld [vmem:[%s3404_s2 + $0x1d8] sm:$0xff] }
 0x22e   :  { %v557_v24 = vpack.c.bf16 %v527_v51, %v526_v52 }
 0x22f   :  { %1555 = vmatpush.bf16.msrb.mxu0 %v1535_v33  ;;  %v993_v39 = vmul.f32 %v3015_v25, %v753_v37 }
 0x231   :  { %1599 = vmatpush.bf16.msrb.mxu3 %v1583_v8  ;;  %v1433_v8 = vsel %vm1426_vm1, %v3216_v15, -inf  ;;  %v1053_v35 = vpack.c.bf16 %v993_v39, %v993_v39 }
 0x232   :  { %1434 = vmax.xlane.f32.xlu0 %v1433_v8  ;;  %v523_v8 = vld [vmem:[%s3404_s2 + $0x1b8] sm:$0xff] }
 0x233   :  { %1643 = vmatpush.bf16.msra.mxu0 %v1631_v40  ;;  %v779_v41 = vpop.f32.mrf.mxu2  ;;  %v1617_v30 = vunpack.c.l.b16 %v1053_v35  ;;  %v778_v40 = vadd.f32 %v3287_v3, %v777_v21 }
 0x234   :  { %v780_v39 = vadd.f32 %v3287_v3, %v779_v41 }
 0x235   :  { %1600 = vmatpush.bf16.msrb.mxu3 %v1582_v34  ;;  %v998_v34 = vmul.f32 %v3080_v45, %v765_v23  ;;  %v522_v23 = vld [vmem:[%s3404_s2 + $0x1b0] sm:$0xff]  ;;  %v1627_v38 = vpack.c.b16 %v1618_v22, %v1617_v30 }
 0x236   :  { %v555_v9 = vpack.c.bf16 %v523_v8, %v522_v23  ;;  %v1003_v23 = vmul.f32 %v3015_v25, %v778_v40  ;;  %v1004_v8 = vmul.f32 %v3021_v17, %v780_v39  ;;  %v1199_v39 = vadd.f32 %v3239_v46, %v3438_v47 }
 0x237   :  { %v1058_v54 = vpack.c.bf16 %v998_v34, %v998_v34  ;;  %1644 = vmatpush.bf16.msra.mxu0 %v1630_v60 }
 0x238   :  { %1974 = vmatmul.msk.bf16.gmra.mxu2 %vm75_vm0, %v555_v9 }
 0x239   :  { %1601 = vmatpush.bf16.msrb.mxu3 %v3442_v59  ;;  %v1622_v55 = vunpack.c.l.b16 %v1058_v54  ;;  %v525_v59 = vld [vmem:[%s3404_s2 + $0x1c8] sm:$0xff] }
 0x23a   :  { %v556_v61 = vpack.c.bf16 %v525_v59, %v524_v62 }
 0x23b   :  { %v1629_v58 = vpack.c.b16 %v1622_v55, %v1621_v32  ;;  %v782_v18 = vpop.f32.mrf.mxu2 }
 0x23c   :  { %v783_v35 = vadd.f32 %v3287_v3, %v782_v18  ;;  %v1063_v18 = vpack.c.bf16 %v1003_v23, %v1003_v23 }
 0x23d   :  { %1645 = vmatpush.bf16.msra.mxu0 %v1629_v58 }
 0x23e   :  { %v1429_v28 = vpop.xlane.xlu0 %1428  ;;  %v1005_v22 = vmul.f32 %v3057_v48, %v783_v35 }
 0x23f   :  { %v1445_v20 = vsub.f32 %v3445_v4, %v1429_v28  ;;  %v1064_v28 = vpack.c.bf16 %v1004_v8, %v1004_v8 }
 0x240   :  { %v1065_v62 = vpack.c.bf16 %v1005_v22, %v1005_v22 }
 0x241   :  { %1646 = vmatpush.bf16.msra.mxu0 %v1628_v63  ;;  %v1451_v34 = vmul.f32 1.442695, %v1445_v20 }
 0x243   :  { %v784_v53 = vpop.f32.mrf.mxu2  ;;  %2022 = vpow2.f32 %v1451_v34 }
 0x244   :  { %v785_v43 = vadd.f32 %v3287_v3, %v784_v53 }
 0x245   :  { %1647 = vmatpush.bf16.msra.mxu0 %v1627_v38 }
 0x246   :  { %v1006_v63 = vmul.f32 %v3063_v0, %v785_v43 }
 0x248   :  { %1975 = vmatmul.msk.bf16.gmra.mxu2 %vm75_vm0, %v556_v61  ;;  %v1066_v59 = vpack.c.bf16 %v1006_v63, %v1006_v63  ;;  %v1663_v61 = vunpack.c.l.b16 %v1063_v18 }
 0x249   :  { %v2023_v42 = vpop.eup %2022 }
 0x24a   :  { %v3267_v10 = vpack.c.bf16 %v2023_v42, %v2023_v42  ;;  %v1664_v42 = vunpack.c.l.b16 %v1064_v28  ;;  %v1749_v28 = vpack.c.bf16 %v2969_v12, %v2963_v56 }
 0x24b   :  { %v787_v36 = vpop.f32.mrf.mxu2 }
 0x24c   :  { %1983 = vmatmul.msk.bf16.vlgmr.msra.gmra.mxu3 %vm1426_vm1, %v3267_v10  ;;  %v788_v7 = vadd.f32 %v3287_v3, %v787_v36 }
 0x24e   :  { %v1007_v14 = vmul.f32 %v3046_v31, %v788_v7 }
 0x250   :  { %v1067_v53 = vpack.c.bf16 %v1007_v14, %v1007_v14 }
 0x253   :  { %v789_v6 = vpop.f32.mrf.mxu2 }
 0x254   :  { %v790_v1 = vadd.f32 %v3287_v3, %v789_v6  ;;  %v1667_v6 = vunpack.c.l.b16 %v1067_v53 }
 0x256   :  { %v1008_v27 = vmul.f32 %v3080_v45, %v790_v1 }
 0x258   :  { %1976 = vmatmul.msk.bf16.gmra.mxu2 %vm75_vm0, %v557_v24  ;;  %v1068_v4 = vpack.c.bf16 %v1008_v27, %v1008_v27  ;;  %v1666_v24 = vunpack.c.l.b16 %v1066_v59 }
 0x25a   :  { %v1668_v52 = vunpack.c.l.b16 %v1068_v4  ;;  %v1748_v4 = vpack.c.bf16 %v2995_v57, %v2989_v29 }
 0x25b   :  { %v792_v37 = vpop.f32.mrf.mxu2 }
 0x25c   :  { %v793_v16 = vadd.f32 %v3287_v3, %v792_v37  ;;  %v1665_v37 = vunpack.c.l.b16 %v1065_v62  ;;  %v1745_v62 = vpack.c.bf16 %v3021_v17, %v3015_v25 }
 0x25e   :  { %v1009_v44 = vmul.f32 %v2989_v29, %v793_v16 }
 0x260   :  { %v1069_v58 = vpack.c.bf16 %v1009_v44, %v1009_v44 }
 0x262   :  { %v1669_v20 = vunpack.c.l.b16 %v1069_v58 }
 0x263   :  { %v794_v13 = vpop.f32.mrf.mxu2 }
 0x264   :  { %v795_v50 = vadd.f32 %v3287_v3, %v794_v13  ;;  %v1675_v13 = vpack.c.b16 %v1668_v52, %v1667_v6 }
 0x266   :  { %v1010_v32 = vmul.f32 %v2995_v57, %v795_v50 }
 0x268   :  { %v1070_v9 = vpack.c.bf16 %v1010_v32, %v1010_v32  ;;  %v1430_v32 = vsel %vm1426_vm1, %v1199_v39, -inf }
 0x26a   :  { %v1670_v34 = vunpack.c.l.b16 %v1070_v9 }
 0x26b   :  { %v797_v5 = vpop.f32.mrf.mxu2 }
 0x26c   :  { %v798_v49 = vadd.f32 %v3287_v3, %v797_v5  ;;  %v1676_v51 = vpack.c.b16 %v1670_v34, %v1669_v20  ;;  %v1747_v20 = vpack.c.bf16 %v3080_v45, %v3046_v31 }
 0x26e   :  { %v1310_v33 = vpop.f32.mrf.mxu0  ;;  %v1011_v2 = vmul.f32 %v2963_v56, %v798_v49 }
 0x26f   :  { %v3280_v19 = vadd.f32 %v1310_v33, %v3438_v47  ;;  %v1673_v33 = vpack.c.b16 %v1664_v42, %v1663_v61 }
 0x270   :  { %v1071_v55 = vpack.c.bf16 %v1011_v2, %v1011_v2 }
 0x271   :  { %v1436_v26 = vsel %vm1426_vm1, %v3280_v19, -inf }
 0x272   :  { %1437 = vmax.xlane.f32.xlu2 %v1436_v26  ;;  %v1671_v41 = vunpack.c.l.b16 %v1071_v55  ;;  %v1674_v26 = vpack.c.b16 %v1666_v24, %v1665_v37 }
 0x273   :  { %v799_v11 = vpop.f32.mrf.mxu2 }
 0x274   :  { %v800_v60 = vadd.f32 %v3287_v3, %v799_v11 }
 0x276   :  { %v1312_v54 = vpop.f32.mrf.mxu0  ;;  %v1012_v21 = vmul.f32 %v2969_v12, %v800_v60 }
 0x278   :  { %v1072_v30 = vpack.c.bf16 %v1012_v21, %v1012_v21 }
 0x27a   :  { %v1672_v38 = vunpack.c.l.b16 %v1072_v30 }
 0x27c   :  { %v1677_v36 = vpack.c.b16 %v1672_v38, %v1671_v41 }
 0x27e   :  { %1689 = vmatpush.bf16.msra.mxu3 %v1677_v36  ;;  %v1746_v36 = vpack.c.bf16 %v3063_v0, %v3057_v48 }
 0x282   :  { %1690 = vmatpush.bf16.msra.mxu3 %v1676_v51 }
 0x286   :  { %1691 = vmatpush.bf16.msra.mxu3 %v1675_v13 }
 0x28a   :  { %1692 = vmatpush.bf16.msra.mxu3 %v1674_v26 }
 0x28e   :  { %1693 = vmatpush.bf16.msra.mxu3 %v1673_v33 }
 0x292   :  { %v802_v35 = vpop.f32.mrf.mxu2 }
 0x296   :  { %v1422_v5 = vpop.f32.mrf.mxu0 }
 0x297   :  { %v3310_v49 = vadd.f32 %v1422_v5, %v3438_v47  ;;  %v1366_v16 = vpop.f32.mrf.mxu3 }
 0x298   :  { %v1367_v50 = vadd.f32 %v1366_v16, %v3438_v47  ;;  %v803_v47 = vadd.f32 %v3287_v3, %v802_v35 }
 0x299   :  { %v1442_v54 = vsel %vm1426_vm1, %v3310_v49, -inf }
 0x29a   :  { %1443 = vmax.xlane.f32.xlu2 %v1442_v54  ;;  %v1439_v40 = vsel %vm1426_vm1, %v1367_v50, -inf  ;;  %v804_v43 = vpop.f32.mrf.mxu2  ;;  %v1013_v46 = vmul.f32 %v3015_v25, %v803_v47 }
 0x29b   :  { %1440 = vmax.xlane.f32.xlu1 %v1439_v40 }
 0x29c   :  { %v1073_v27 = vpack.c.bf16 %v1013_v46, %v1013_v46 }
 0x29e   :  { %v1424_v2 = vpop.f32.mrf.mxu0  ;;  %v3330_v41 = vunpack.c.l.b16 %v1073_v27 }
 0x29f   :  { %v1368_v11 = vpop.f32.mrf.mxu3 }
 0x2a2   :  { %v807_v21 = vpop.f32.mrf.mxu2 }
 0x2a3   :  { %1431 = vmax.xlane.f32.xlu1 %v1430_v32 }
 0x2a5   :  { %v1435_v7 = vpop.xlane.xlu0 %1434 }
 0x2a6   :  { %v1447_v1 = vsub.f32 %v3216_v15, %v1435_v7  ;;  %v805_v15 = vadd.f32 %v3287_v3, %v804_v43 }
 0x2a8   :  { %v1455_v44 = vmul.f32 1.442695, %v1447_v1  ;;  %v1014_v8 = vmul.f32 %v3021_v17, %v805_v15 }
 0x2aa   :  { %2024 = vpow2.f32 %v1455_v44  ;;  %v809_v23 = vpop.f32.mrf.mxu2  ;;  %v1074_v58 = vpack.c.bf16 %v1014_v8, %v1014_v8 }
 0x2ab   :  { %v810_v44 = vadd.f32 %v3287_v3, %v809_v23 }
 0x2ac   :  { %v3332_v30 = vunpack.c.l.b16 %v1074_v58 }
 0x2ad   :  { %v1016_v27 = vmul.f32 %v3063_v0, %v810_v44 }
 0x2ae   :  { %v1719_v63 = vpack.c.b16 %v3332_v30, %v3330_v41  ;;  %v2010_v41 = vld [vmem:[%s3411_s9 + $0x8] sm:$0xff]  ;;  %v2009_v30 = vld [vmem:[%s3411_s9] sm:$0xff] }
 0x2af   :  { %v1076_v23 = vpack.c.bf16 %v1016_v27, %v1016_v27 }
 0x2b0   :  { %v2025_v55 = vpop.eup %2024 }
 0x2b1   :  { %v3320_v60 = vpack.c.bf16 %v2025_v55, %v2025_v55 }
 0x2b3   :  { %1985 = vmatmul.msk.bf16.vlgmr.msrb.gmra.mxu3 %vm1426_vm1, %v3320_v60 }
 0x2b4   :  { %1777 = vmatpush.bf16.msrb.mxu3 %v1749_v28 }
 0x2b8   :  { %1778 = vmatpush.bf16.msrb.mxu3 %v1748_v4 }
 0x2bb   :  { %v812_v14 = vpop.f32.mrf.mxu2 }
 0x2bc   :  { %1779 = vmatpush.bf16.msrb.mxu3 %v1747_v20  ;;  %v813_v7 = vadd.f32 %v3287_v3, %v812_v14 }
 0x2be   :  { %v1017_v32 = vmul.f32 %v3046_v31, %v813_v7 }
 0x2c0   :  { %1780 = vmatpush.bf16.msrb.mxu3 %v1746_v36  ;;  %v1077_v58 = vpack.c.bf16 %v1017_v32, %v1017_v32 }
 0x2c3   :  { %v814_v38 = vpop.f32.mrf.mxu2 }
 0x2c4   :  { %1781 = vmatpush.bf16.msrb.mxu3 %v1745_v62  ;;  %v815_v1 = vadd.f32 %v3287_v3, %v814_v38  ;;  %v1713_v38 = vunpack.c.l.b16 %v1077_v58 }
 0x2c6   :  { %v1018_v55 = vmul.f32 %v3080_v45, %v815_v1 }
 0x2cb   :  { %v817_v18 = vpop.f32.mrf.mxu2 }
 0x2cc   :  { %v818_v37 = vadd.f32 %v3287_v3, %v817_v18  ;;  %v1756_v18 = vunpack.c.l.b16 %v3267_v10 }
 0x2ce   :  { %v1019_v17 = vmul.f32 %v2989_v29, %v818_v37 }
 0x2cf   :  { %v3328_v9 = vpop.f32.mrf.mxu3 }
 0x2d3   :  { %v819_v53 = vpop.f32.mrf.mxu2 }
 0x2d4   :  { %v820_v24 = vadd.f32 %v3287_v3, %v819_v53  ;;  %v1712_v53 = vunpack.c.l.b16 %v1076_v23 }
 0x2d6   :  { %v1020_v54 = vmul.f32 %v2995_v57, %v820_v24  ;;  %v808_v57 = vadd.f32 %v3287_v3, %v807_v21 }
 0x2d7   :  { %v1513_v22 = vpop.f32.mrf.mxu3 }
 0x2d8   :  { %v1015_v14 = vmul.f32 %v3057_v48, %v808_v57  ;;  %v1078_v22 = vpack.c.bf16 %v1018_v55, %v1018_v55 }
 0x2da   :  { %v1075_v45 = vpack.c.bf16 %v1015_v14, %v1015_v14 }
 0x2db   :  { %v822_v34 = vpop.f32.mrf.mxu2 }
 0x2dc   :  { %v823_v52 = vadd.f32 %v3287_v3, %v822_v34  ;;  %v1711_v48 = vunpack.c.l.b16 %v1075_v45 }
 0x2de   :  { %v1021_v13 = vmul.f32 %v2963_v56, %v823_v52  ;;  %v1079_v56 = vpack.c.bf16 %v1019_v17, %v1019_v17  ;;  %v1720_v36 = vpack.c.b16 %v1712_v53, %v1711_v48 }
 0x2e0   :  { %v1081_v16 = vpack.c.bf16 %v1021_v13, %v1021_v13  ;;  %v1715_v47 = vunpack.c.l.b16 %v1079_v56 }
 0x2e3   :  { %v824_v61 = vpop.f32.mrf.mxu2 }
 0x2e4   :  { %v825_v51 = vadd.f32 %v3287_v3, %v824_v61 }
 0x2e5   :  { %v1438_v11 = vpop.xlane.xlu2 %1437 }
 0x2e6   :  { %v1022_v33 = vmul.f32 %v2969_v12, %v825_v51  ;;  %v1080_v12 = vpack.c.bf16 %v1020_v54, %v1020_v54  ;;  %v1448_v43 = vsub.f32 %v3280_v19, %v1438_v11  ;;  %v1714_v19 = vunpack.c.l.b16 %v1078_v22 }
 0x2e8   :  { %v1082_v2 = vpack.c.bf16 %v1022_v33, %v1022_v33  ;;  %v1716_v15 = vunpack.c.l.b16 %v1080_v12  ;;  %v1457_v3 = vmul.f32 1.442695, %v1448_v43  ;;  %v1721_v0 = vpack.c.b16 %v1714_v19, %v1713_v38 }
 0x2ea   :  { %v1718_v29 = vunpack.c.l.b16 %v1082_v2  ;;  %v1722_v31 = vpack.c.b16 %v1716_v15, %v1715_v47 }
 0x30d   :  { %v1444_v4 = vpop.xlane.xlu2 %1443 }
 0x30e   :  { %v1441_v59 = vpop.xlane.xlu1 %1440  ;;  %v1450_v62 = vsub.f32 %v3310_v49, %v1444_v4 }
 0x30f   :  { %v1449_v42 = vsub.f32 %v1367_v50, %v1441_v59 }
 0x310   :  { %v1461_v10 = vmul.f32 1.442695, %v1450_v62 }
 0x311   :  { %v1459_v6 = vmul.f32 1.442695, %v1449_v42 }
 0x313   :  { %2026 = vpow2.f32 %v1459_v6  ;;  %v1758_v6 = vunpack.c.l.b16 %v3320_v60 }
 0x316   :  { %v1432_v26 = vpop.xlane.xlu1 %1431 }
 0x317   :  { %v1446_v25 = vsub.f32 %v1199_v39, %v1432_v26  ;;  %v1717_v39 = vunpack.c.l.b16 %v1081_v16 }
 0x319   :  { %v2027_v5 = vpop.eup %2026  ;;  %v1453_v50 = vmul.f32 1.442695, %v1446_v25  ;;  %v1723_v46 = vpack.c.b16 %v1718_v29, %v1717_v39 }
 0x31a   :  { %v3354_v40 = vpack.c.bf16 %v2027_v5, %v2027_v5 }
 0x31b   :  { %2028 = vpow2.f32 %v1453_v50 }
 0x31c   :  { %1987 = vmatmul.msk.bf16.vlgmr.msra.gmra.mxu3 %vm1426_vm1, %v3354_v40  ;;  %2030 = vpow2.f32 %v1457_v3  ;;  %v1760_v49 = vunpack.c.l.b16 %v3354_v40 }
 0x31d   :  { %2032 = vpow2.f32 %v1461_v10 }
 0x321   :  { %v2029_v35 = vpop.eup %2028 }
 0x322   :  { %v1464_v8 = vpack.c.bf16 %v2029_v35, %v2029_v35  ;;  %v2031_v20 = vpop.eup %2030 }
 0x323   :  { %v1466_v59 = vpack.c.bf16 %v2031_v20, %v2031_v20  ;;  %v2033_v51 = vpop.eup %2032 }
 0x324   :  { %1984 = vmatmul.msk.bf16.vlgmr.msrb.gmra.mxu0 %vm1426_vm1, %v1464_v8  ;;  %v1757_v21 = vunpack.c.l.b16 %v1464_v8  ;;  %v1468_v37 = vpack.c.bf16 %v2033_v51, %v2033_v51  ;;  %v2021_v8 = vld [vmem:[%s3412_s10] ss:$0 sm:$0xff]  ;;  %s2084_s10 = smov [#allocation2]  }
 0x325   :  { %1735 = vmatpush.bf16.msrb.mxu0 %v1723_v46  ;;  %v1759_v61 = vunpack.c.l.b16 %v1466_v59  ;;  %s1876_s28 = sshll.u32 %s2084_s10, 4  ;;  %s1877_s28 = int_to_ptr.vmem [resolvable:$true] %s1876_s28 }
 0x326   :  { %v1762_v28 = vpack.c.b16 %v1757_v21, %v1756_v18  ;;  %v1761_v24 = vunpack.c.l.b16 %v1468_v37 }
 0x327   :  { %v1763_v52 = vpack.c.b16 %v1759_v61, %v1758_v6 }
 0x328   :  { %v1764_v13 = vpack.c.b16 %v1761_v24, %v1760_v49 }
 0x329   :  { %1736 = vmatpush.bf16.msrb.mxu0 %v1722_v31 }
 0x32c   :  { %1989 = vmatmul.msk.bf16.vlgmr.msrb.gmra.mxu3 %vm1426_vm1, %v1762_v28 }
 0x32d   :  { %1737 = vmatpush.bf16.msrb.mxu0 %v1721_v0 }
 0x331   :  { %1738 = vmatpush.bf16.msrb.mxu0 %v1720_v36 }
 0x334   :  { %1986 = vmatmul.msk.bf16.vlgmr.msra.gmra.mxu0 %vm1426_vm1, %v1466_v59 }
 0x335   :  { %1739 = vmatpush.bf16.msrb.mxu0 %v1719_v63 }
 0x336   :  { %v1603_v34 = vpop.f32.mrf.mxu3 }
 0x339   :  { %1848 = vmatpush.bf16.msra.mxu0 %v2010_v41 }
 0x33c   :  { %1990 = vmatmul.msk.bf16.gmra.mxu3 %vm1426_vm1, %v1763_v52 }
 0x33d   :  { %1849 = vmatpush.bf16.msra.mxu0 %v2009_v30 }
 0x33e   :  { %v1605_v42 = vpop.f32.mrf.mxu3 }
 0x344   :  { %1988 = vmatmul.msk.bf16.vlgmr.msrb.gmra.mxu0 %vm1426_vm1, %v1468_v37 }
 0x34c   :  { %1991 = vmatmul.msk.bf16.gmra.mxu3 %vm1426_vm1, %v1764_v13 }
 0x39f   :  { %v1695_v60 = vpop.f32.mrf.mxu3 }
 0x3a1   :  { %v1557_v63 = vpop.f32.mrf.mxu0 }
 0x3a7   :  { %v1697_v33 = vpop.f32.mrf.mxu3 }
 0x3a9   :  { %v1559_v26 = vpop.f32.mrf.mxu0 }
 0x3af   :  { %v1783_v25 = vpop.f32.mrf.mxu3 }
 0x3b0   :  { %2034 = vrcp.f32 %v1783_v25 }
 0x3b1   :  { %v1649_v17 = vpop.f32.mrf.mxu0 }
 0x3b6   :  { %v2035_v16 = vpop.eup %2034 }
 0x3b7   :  { %v1785_v5 = vpop.f32.mrf.mxu3  ;;  %v1804_v2 = vmul.f32 %v2035_v16, %v3328_v9 }
 0x3b8   :  { %2036 = vrcp.f32 %v1785_v5 }
 0x3b9   :  { %v1651_v54 = vpop.f32.mrf.mxu0 }
 0x3be   :  { %v2037_v50 = vpop.eup %2036 }
 0x3bf   :  { %v1805_v40 = vmul.f32 %v2037_v50, %v1557_v63  ;;  %v1788_v7 = vpop.f32.mrf.mxu3 }
 0x3c0   :  { %2038 = vrcp.f32 %v1788_v7 }
 0x3c1   :  { %v1810_v1 = vpack.c.bf16 %v1805_v40, %v1804_v2  ;;  %v1741_v56 = vpop.f32.mrf.mxu0 }
 0x3c3   :  { %2000 = vmatmul.msk.bf16.vlgmr.msra.gmra.mxu0 %vm75_vm0, %v1810_v1 }
 0x3c6   :  { %v2039_v29 = vpop.eup %2038 }
 0x3c7   :  { %v1790_v12 = vpop.f32.mrf.mxu3  ;;  %v1806_v57 = vmul.f32 %v2039_v29, %v1603_v34 }
 0x3c8   :  { %2040 = vrcp.f32 %v1790_v12 }
 0x3c9   :  { %v1743_v39 = vpop.f32.mrf.mxu0 }
 0x3ce   :  { %v2041_v11 = vpop.eup %2040 }
 0x3cf   :  { %v1807_v44 = vmul.f32 %v2041_v11, %v1649_v17  ;;  %v1793_v32 = vpop.f32.mrf.mxu3 }
 0x3d0   :  { %2042 = vrcp.f32 %v1793_v32 }
 0x3d1   :  { %v1811_v55 = vpack.c.bf16 %v1807_v44, %v1806_v57 }
 0x3d3   :  { %2001 = vmatmul.msk.bf16.gmra.mxu0 %vm75_vm0, %v1811_v55 }
 0x3d6   :  { %v2043_v35 = vpop.eup %2042 }
 0x3d7   :  { %v1795_v9 = vpop.f32.mrf.mxu3  ;;  %v1808_v47 = vmul.f32 %v2043_v35, %v1695_v60 }
 0x3d8   :  { %2044 = vrcp.f32 %v1795_v9 }
 0x3de   :  { %v2045_v43 = vpop.eup %2044 }
 0x3df   :  { %v1809_v15 = vmul.f32 %v2045_v43, %v1741_v56 }
 0x3e1   :  { %v1812_v46 = vpack.c.bf16 %v1809_v15, %v1808_v47 }
 0x3e3   :  { %2002 = vmatmul.msk.bf16.gmra.mxu0 %vm75_vm0, %v1812_v46 }
 0x440   :  { %v1851_v14 = vpop.f32.mrf.mxu0 }
 0x441   :  { %v1852_v27 = vadd.f32 %v2021_v8, %v1851_v14 }
 0x443   :  { %1866 = vst.msk [vmem:[#allocation2] sm:$0xff] %vm75_vm0, %v1852_v27 }
 0x448   :  { %v1853_v58 = vpop.f32.mrf.mxu0 }
 0x449   :  { %v1854_v22 = vadd.f32 %v2021_v8, %v1853_v58 }
 0x44b   :  { %1867 = vst.msk [vmem:[#allocation2 + $0x8] sm:$0xff] %vm75_vm0, %v1854_v22 }
 0x450   :  { %v1856_v3 = vpop.f32.mrf.mxu0 }
 0x451   :  { %v1857_v31 = vadd.f32 %v2021_v8, %v1856_v3 }
 0x453   :  { %1868 = vst.msk [vmem:[#allocation2 + $0x10] sm:$0xff] %vm75_vm0, %v1857_v31 }
 0x458   :  { %v1858_v21 = vpop.f32.mrf.mxu0 }
 0x459   :  { %v1859_v45 = vadd.f32 %v2021_v8, %v1858_v21 }
 0x45b   :  { %1869 = vst.msk [vmem:[#allocation2 + $0x18] sm:$0xff] %vm75_vm0, %v1859_v45 }
 0x460   :  { %v1861_v23 = vpop.f32.mrf.mxu0 }
 0x461   :  { %v1862_v38 = vadd.f32 %v2021_v8, %v1861_v23 }
 0x463   :  { %1870 = vst.msk [vmem:[#allocation2 + $0x20] sm:$0xff] %vm75_vm0, %v1862_v38 }
 0x468   :  { %v1863_v19 = vpop.f32.mrf.mxu0 }
 0x469   :  { %v1864_v18 = vadd.f32 %v2021_v8, %v1863_v19 }
 0x46b   :  { %1871 = vst.msk [vmem:[#allocation2 + $0x28] sm:$0xff] %vm75_vm0, %v1864_v18 }
 0x46c   :  { %1884 = dma.vmem_to_hbm [thread:$0]  %s1877_s28, 768, %s1879_s30, [#allocation3], %s2085_s14, %s2085_s14, %s2086_s15  }
 0x46d   :  { %2082 = dma.done.wait [#allocation3], 768  }
 0x46e   :  { %2083 = vsyncadd [#allocation3], 4294966528 }
 0x46f   :  { %1889 = vsyncpa [#allocation3], 1 }

</bundles_post_ra>
